<compile_context>
chip_gen: v6e
topology: v6e:2x2x1
jax: 0.10.0
libtpu: 0.0.40
codegen_flags: <defaults>
</compile_context>

<pallas_src>
import jax
import jax.numpy as jnp
from jax import lax
from jax.experimental import pallas as pl
from jax.experimental.pallas import tpu as pltpu


def _round_up(x, m):
    return (x + m - 1) // m * m


def lstm_recurrence_kernel(pre_ref, whh_ref, wout_ref, bout_ref, out_ref,
                           h_sc, c_sc, sum_sc):
    """pre_ref: (T, B_blk, 4*Hp) bf16  -- x @ W_ih^T + b, precomputed & gate-padded
       whh_ref: (Hp, 4*Hp) bf16        -- W_hh^T, gate-padded
       wout_ref: (Hp, Cp) bf16         -- W_out^T, padded
       bout_ref: (1, Cp) f32
       out_ref:  (B_blk, Cp) f32
       h_sc/c_sc/sum_sc: (B_blk, Hp) f32 scratch."""
    T = pre_ref.shape[0]
    Hp = whh_ref.shape[0]

    # Fresh state for this batch block (grid axis is 'parallel' over batch blocks).
    h_sc[...] = jnp.zeros_like(h_sc)
    c_sc[...] = jnp.zeros_like(c_sc)
    sum_sc[...] = jnp.zeros_like(sum_sc)

    def step(t, carry):
        # Only the h-dependent projection stays in the loop; bias is already folded
        # into pre_ref (no per-iteration broadcast).
        gates = (pre_ref[t].astype(jnp.float32)
                 + jnp.dot(h_sc[...].astype(whh_ref.dtype), whh_ref[...],
                           preferred_element_type=jnp.float32))
        # PyTorch gate order: i, f, g, o — each gate owns a lane-aligned 128-wide block.
        i = jax.nn.sigmoid(gates[:, 0 * Hp:1 * Hp])
        f = jax.nn.sigmoid(gates[:, 1 * Hp:2 * Hp])
        g = jnp.tanh(gates[:, 2 * Hp:3 * Hp])
        o = jax.nn.sigmoid(gates[:, 3 * Hp:4 * Hp])
        c_new = f * c_sc[...] + i * g
        h_new = o * jnp.tanh(c_new)
        c_sc[...] = c_new
        h_sc[...] = h_new
        sum_sc[...] = sum_sc[...] + h_new
        return carry

    # Unrolled fixed-trip-count loop: gives the LLO scheduler cross-step visibility.
    lax.fori_loop(0, T, step, 0, unroll=True)

    # mean over time + final Linear, fused into the same kernel (lane-dense output).
    mean = sum_sc[...] * (1.0 / T)
    out_ref[...] = (jnp.dot(mean.astype(wout_ref.dtype), wout_ref[...],
                            preferred_element_type=jnp.float32)
                    + bout_ref[...])


def rnn_model_forward(words, params, compute_dtype=jnp.bfloat16):
    """words: (B, T) int32 token ids.  Returns logits (B, num_classes), f32."""
    emb_table = params["embedding"]          # (dict_size, E)
    w_ih = params["w_ih"]                    # (4H, E)  (PyTorch layout)
    w_hh = params["w_hh"]                    # (4H, H)
    b_ih = params["b_ih"]                    # (4H,)
    b_hh = params["b_hh"]                    # (4H,)
    w_out = params["w_out"]                  # (C, H)
    b_out = params["b_out"]                  # (C,)

    B, T = words.shape
    H = w_hh.shape[1]
    C = w_out.shape[0]

    Hp = _round_up(H, 128)                   # each gate gets its own 128-lane slot
    Bp = _round_up(B, 8)                     # sublane granule
    Cp = _round_up(C, 128)                   # lane-dense output store
    G = 4 * Hp

    # ---- weight layout prep: pad each gate block of the (4H, K) weights independently
    # so padded gate lanes have exactly-zero pre-activations (=> padded h stays 0). ----
    def pad_gate_rows(w):                    # (4H, K) -> (4*Hp, K)
        K = w.shape[-1]
        w4 = w.reshape(4, H, K)
        w4 = jnp.pad(w4, ((0, 0), (0, Hp - H), (0, 0)))
        return w4.reshape(4 * Hp, K)

    bias = (b_ih + b_hh).reshape(4, H)
    bias = jnp.pad(bias, ((0, 0), (0, Hp - H))).reshape(1, 1, G)   # (1,1,G) f32

    wih_p = pad_gate_rows(w_ih)                                     # (G, E)
    whh_p = jnp.pad(pad_gate_rows(w_hh), ((0, 0), (0, Hp - H)))     # (G, Hp)
    wout_p = jnp.pad(w_out, ((0, Cp - C), (0, Hp - H)))             # (Cp, Hp)
    bout_p = jnp.pad(b_out, (0, Cp - C)).reshape(1, Cp)             # (1, Cp) f32

    # ---- glue: embedding gather + hoisted input projection as ONE big matmul.
    # Output is produced time-major directly (no separate activation transpose). ----
    x = emb_table[words]                                            # (B, T, E)
    pre = jnp.einsum("bte,ge->tbg",
                     x.astype(compute_dtype), wih_p.astype(compute_dtype),
                     preferred_element_type=jnp.float32) + bias     # (T, B, G) f32
    pre = jnp.pad(pre, ((0, 0), (0, Bp - B), (0, 0))).astype(compute_dtype)

    whh_t = whh_p.T.astype(compute_dtype)                           # (Hp, G)
    wout_t = wout_p.T.astype(compute_dtype)                         # (Hp, Cp)
    bout = bout_p.astype(jnp.float32)                               # (1, Cp)

    # One batch block at toy sizes; for large B on v7x shrink B_blk so the 'parallel'
    # batch axis is sharded across both TensorCores (each carries its own h/c/sum).
    B_blk = Bp
    n_b = Bp // B_blk

    out = pl.pallas_call(
        lstm_recurrence_kernel,
        out_shape=jax.ShapeDtypeStruct((Bp, Cp), jnp.float32),
        grid_spec=pltpu.PrefetchScalarGridSpec(
            num_scalar_prefetch=0,
            grid=(n_b,),
            in_specs=[
                pl.BlockSpec((T, B_blk, G), lambda b: (0, b, 0)),   # pre-activations
                pl.BlockSpec((Hp, G), lambda b: (0, 0)),            # W_hh^T
                pl.BlockSpec((Hp, Cp), lambda b: (0, 0)),           # W_out^T
                pl.BlockSpec((1, Cp), lambda b: (0, 0)),            # b_out
            ],
            out_specs=pl.BlockSpec((B_blk, Cp), lambda b: (b, 0)),
            scratch_shapes=[
                pltpu.VMEM((B_blk, Hp), jnp.float32),   # h
                pltpu.VMEM((B_blk, Hp), jnp.float32),   # c
                pltpu.VMEM((B_blk, Hp), jnp.float32),   # sum of h over time
            ],
        ),
        compiler_params=pltpu.CompilerParams(
            dimension_semantics=("parallel",),          # batch blocks are independent
            # NOTE: for production T/B/H, raise vmem_limit_bytes (v6e) and chunk T
            # against the 64 MiB VMEM on v7x; unnecessary at these toy sizes.
        ),
    )(pre, whh_t, wout_t, bout)

    return out[:B, :C]


def reference_forward(words, params):
    """Pure-JAX f32 reference of the PyTorch forward for correctness checking."""
    emb = params["embedding"][words]                 # (B, T, E)
    B, T, E = emb.shape
    H = params["w_hh"].shape[1]

    def step(carry, x_t):
        h, c = carry
        gates = (x_t @ params["w_ih"].T + params["b_ih"]
                 + h @ params["w_hh"].T + params["b_hh"])
        i = jax.nn.sigmoid(gates[:, 0 * H:1 * H])
        f = jax.nn.sigmoid(gates[:, 1 * H:2 * H])
        g = jnp.tanh(gates[:, 2 * H:3 * H])
        o = jax.nn.sigmoid(gates[:, 3 * H:4 * H])
        c = f * c + i * g
        h = o * jnp.tanh(c)
        return (h, c), h

    h0 = jnp.zeros((B, H), jnp.float32)
    c0 = jnp.zeros((B, H), jnp.float32)
    _, hs = jax.lax.scan(step, (h0, c0), jnp.transpose(emb, (1, 0, 2)))
    mean = hs.sum(0) / T
    return mean @ params["w_out"].T + params["b_out"]


def make_params(key, dict_size, embedding_dim, hidden_dim, num_classes):
    ks = jax.random.split(key, 7)
    scale = 0.1
    return {
        "embedding": scale * jax.random.normal(ks[0], (dict_size, embedding_dim), jnp.float32),
        "w_ih": scale * jax.random.normal(ks[1], (4 * hidden_dim, embedding_dim), jnp.float32),
        "w_hh": scale * jax.random.normal(ks[2], (4 * hidden_dim, hidden_dim), jnp.float32),
        "b_ih": scale * jax.random.normal(ks[3], (4 * hidden_dim,), jnp.float32),
        "b_hh": scale * jax.random.normal(ks[4], (4 * hidden_dim,), jnp.float32),
        "w_out": scale * jax.random.normal(ks[5], (num_classes, hidden_dim), jnp.float32),
        "b_out": scale * jax.random.normal(ks[6], (num_classes,), jnp.float32),
    }


if __name__ == "__main__":
    dict_size, embedding_dim, hidden_dim, num_classes = 50, 32, 32, 4
    B, T = 4, 8

    key = jax.random.PRNGKey(0)
    kp, kw = jax.random.split(key)
    params = make_params(kp, dict_size, embedding_dim, hidden_dim, num_classes)
    words = jax.random.randint(kw, (B, T), 0, dict_size, dtype=jnp.int32)

    forward = jax.jit(rnn_model_forward)
    out = jax.block_until_ready(forward(words, params))
    ref = jax.block_until_ready(reference_forward(words, params))

    assert out.shape == (B, num_classes)
    # bf16 matmul inputs with f32 accumulation -> loose-but-safe tolerance vs f32 ref.
    assert jnp.allclose(out, ref, atol=2e-2, rtol=2e-2), (out, ref)
    print("KERNEL_OK")
</pallas_src>

<mosaic_0001>
module attributes {stable_mosaic.version = 11 : i64} {
  func.func @lstm_recurrence_kernel(%arg0: i32, %arg1: memref<8x8x512xbf16, #tpu.memory_space<vmem>>, %arg2: memref<128x512xbf16, #tpu.memory_space<vmem>>, %arg3: memref<128x128xbf16, #tpu.memory_space<vmem>>, %arg4: memref<1x128xf32, #tpu.memory_space<vmem>>, %arg5: memref<8x128xf32, #tpu.memory_space<vmem>>, %arg6: memref<8x128xf32, #tpu.memory_space<vmem>>, %arg7: memref<8x128xf32, #tpu.memory_space<vmem>>, %arg8: memref<8x128xf32, #tpu.memory_space<vmem>>) attributes {dimension_semantics = [#tpu.dimension_semantics<parallel>], iteration_bounds = array<i64: 1>, scalar_prefetch = 0 : i64, scratch_operands = 3 : i64, tpu.core_type = #tpu.core_type<tc>, window_params = [{transform_indices = @transform_0, window_bounds = array<i64: 8, 8, 512>}, {pipeline_mode = #tpu.pipeline_mode<synchronous>, transform_indices = @transform_1, window_bounds = array<i64: 128, 512>}, {pipeline_mode = #tpu.pipeline_mode<synchronous>, transform_indices = @transform_2, window_bounds = array<i64: 128, 128>}, {pipeline_mode = #tpu.pipeline_mode<synchronous>, transform_indices = @transform_3, window_bounds = array<i64: 1, 128>}, {transform_indices = @transform_4, window_bounds = array<i64: 8, 128>}]} {
    %cst = arith.constant 0.000000e+00 : f32
    %0 = vector.broadcast %cst : f32 to vector<8x128xf32>
    %c0 = arith.constant 0 : index
    %c0_0 = arith.constant 0 : index
    %1 = vector.load %arg6[%c0, %c0_0] : memref<8x128xf32, #tpu.memory_space<vmem>>, vector<8x128xf32>
    tpu.vector_store %arg6[%c0, %c0_0], %0 {strides = array<i32>} : memref<8x128xf32, #tpu.memory_space<vmem>>, vector<8x128xf32>,
    %cst_1 = arith.constant 0.000000e+00 : f32
    %2 = vector.broadcast %cst_1 : f32 to vector<8x128xf32>
    %c0_2 = arith.constant 0 : index
    %c0_3 = arith.constant 0 : index
    %3 = vector.load %arg7[%c0_2, %c0_3] : memref<8x128xf32, #tpu.memory_space<vmem>>, vector<8x128xf32>
    tpu.vector_store %arg7[%c0_2, %c0_3], %2 {strides = array<i32>} : memref<8x128xf32, #tpu.memory_space<vmem>>, vector<8x128xf32>,
    %cst_4 = arith.constant 0.000000e+00 : f32
    %4 = vector.broadcast %cst_4 : f32 to vector<8x128xf32>
    %c0_5 = arith.constant 0 : index
    %c0_6 = arith.constant 0 : index
    %5 = vector.load %arg8[%c0_5, %c0_6] : memref<8x128xf32, #tpu.memory_space<vmem>>, vector<8x128xf32>
    tpu.vector_store %arg8[%c0_5, %c0_6], %4 {strides = array<i32>} : memref<8x128xf32, #tpu.memory_space<vmem>>, vector<8x128xf32>,
    %c0_i32 = arith.constant 0 : i32
    %6 = arith.index_cast %c0_i32 : i32 to index
    %c0_7 = arith.constant 0 : index
    %c0_8 = arith.constant 0 : index
    %7 = vector.load %arg1[%6, %c0_7, %c0_8] : memref<8x8x512xbf16, #tpu.memory_space<vmem>>, vector<1x8x512xbf16>
    %8 = vector.shape_cast %7 : vector<1x8x512xbf16> to vector<8x512xbf16>
    %9 = arith.extf %8 : vector<8x512xbf16> to vector<8x512xf32>
    %c0_9 = arith.constant 0 : index
    %c0_10 = arith.constant 0 : index
    %10 = vector.load %arg6[%c0_9, %c0_10] : memref<8x128xf32, #tpu.memory_space<vmem>>, vector<8x128xf32>
    %11 = arith.truncf %10 : vector<8x128xf32> to vector<8x128xbf16>
    %c0_11 = arith.constant 0 : index
    %c0_12 = arith.constant 0 : index
    %12 = vector.load %arg2[%c0_11, %c0_12] : memref<128x512xbf16, #tpu.memory_space<vmem>>, vector<128x512xbf16>
    %cst_13 = arith.constant dense<0.000000e+00> : vector<8x512xf32>
    %13 = tpu.matmul %11, %12, %cst_13 {dimension_numbers = #tpu.dot_dimension_numbers<[1], [0], [0], [1], [0, 0, 1, 1], [], []>} : vector<8x128xbf16>, vector<128x512xbf16>, vector<8x512xf32> -> vector<8x512xf32>
    %14 = arith.addf %9, %13 : vector<8x512xf32>
    %15 = vector.extract_strided_slice %14 {offsets = [0, 0], sizes = [8, 128], strides = [1, 1]} : vector<8x512xf32> to vector<8x128xf32>
    %16 = arith.negf %15 : vector<8x128xf32>
    %17 = math.exp %16 : vector<8x128xf32>
    %cst_14 = arith.constant 1.000000e+00 : f32
    %18 = vector.broadcast %cst_14 : f32 to vector<8x128xf32>
    %19 = arith.addf %18, %17 : vector<8x128xf32>
    %20 = arith.divf %18, %19 : vector<8x128xf32>
    %21 = vector.extract_strided_slice %14 {offsets = [0, 128], sizes = [8, 128], strides = [1, 1]} : vector<8x512xf32> to vector<8x128xf32>
    %22 = arith.negf %21 : vector<8x128xf32>
    %23 = math.exp %22 : vector<8x128xf32>
    %cst_15 = arith.constant 1.000000e+00 : f32
    %24 = vector.broadcast %cst_15 : f32 to vector<8x128xf32>
    %25 = arith.addf %24, %23 : vector<8x128xf32>
    %26 = arith.divf %24, %25 : vector<8x128xf32>
    %27 = vector.extract_strided_slice %14 {offsets = [0, 256], sizes = [8, 128], strides = [1, 1]} : vector<8x512xf32> to vector<8x128xf32>
    %28 = math.tanh %27 : vector<8x128xf32>
    %29 = vector.extract_strided_slice %14 {offsets = [0, 384], sizes = [8, 128], strides = [1, 1]} : vector<8x512xf32> to vector<8x128xf32>
    %30 = arith.negf %29 : vector<8x128xf32>
    %31 = math.exp %30 : vector<8x128xf32>
    %cst_16 = arith.constant 1.000000e+00 : f32
    %32 = vector.broadcast %cst_16 : f32 to vector<8x128xf32>
    %33 = arith.addf %32, %31 : vector<8x128xf32>
    %34 = arith.divf %32, %33 : vector<8x128xf32>
    %c0_17 = arith.constant 0 : index
    %c0_18 = arith.constant 0 : index
    %35 = vector.load %arg7[%c0_17, %c0_18] : memref<8x128xf32, #tpu.memory_space<vmem>>, vector<8x128xf32>
    %36 = arith.mulf %26, %35 : vector<8x128xf32>
    %37 = arith.mulf %20, %28 : vector<8x128xf32>
    %38 = arith.addf %36, %37 : vector<8x128xf32>
    %39 = math.tanh %38 : vector<8x128xf32>
    %40 = arith.mulf %34, %39 : vector<8x128xf32>
    %c0_19 = arith.constant 0 : index
    %c0_20 = arith.constant 0 : index
    %41 = vector.load %arg7[%c0_19, %c0_20] : memref<8x128xf32, #tpu.memory_space<vmem>>, vector<8x128xf32>
    tpu.vector_store %arg7[%c0_19, %c0_20], %38 {strides = array<i32>} : memref<8x128xf32, #tpu.memory_space<vmem>>, vector<8x128xf32>,
    %c0_21 = arith.constant 0 : index
    %c0_22 = arith.constant 0 : index
    %42 = vector.load %arg6[%c0_21, %c0_22] : memref<8x128xf32, #tpu.memory_space<vmem>>, vector<8x128xf32>
    tpu.vector_store %arg6[%c0_21, %c0_22], %40 {strides = array<i32>} : memref<8x128xf32, #tpu.memory_space<vmem>>, vector<8x128xf32>,
    %c0_23 = arith.constant 0 : index
    %c0_24 = arith.constant 0 : index
    %43 = vector.load %arg8[%c0_23, %c0_24] : memref<8x128xf32, #tpu.memory_space<vmem>>, vector<8x128xf32>
    %44 = arith.addf %43, %40 : vector<8x128xf32>
    %c0_25 = arith.constant 0 : index
    %c0_26 = arith.constant 0 : index
    %45 = vector.load %arg8[%c0_25, %c0_26] : memref<8x128xf32, #tpu.memory_space<vmem>>, vector<8x128xf32>
    tpu.vector_store %arg8[%c0_25, %c0_26], %44 {strides = array<i32>} : memref<8x128xf32, #tpu.memory_space<vmem>>, vector<8x128xf32>,
    %c1_i32 = arith.constant 1 : i32
    %46 = arith.index_cast %c1_i32 : i32 to index
    %c0_27 = arith.constant 0 : index
    %c0_28 = arith.constant 0 : index
    %47 = vector.load %arg1[%46, %c0_27, %c0_28] : memref<8x8x512xbf16, #tpu.memory_space<vmem>>, vector<1x8x512xbf16>
    %48 = vector.shape_cast %47 : vector<1x8x512xbf16> to vector<8x512xbf16>
    %49 = arith.extf %48 : vector<8x512xbf16> to vector<8x512xf32>
    %c0_29 = arith.constant 0 : index
    %c0_30 = arith.constant 0 : index
    %50 = vector.load %arg6[%c0_29, %c0_30] : memref<8x128xf32, #tpu.memory_space<vmem>>, vector<8x128xf32>
    %51 = arith.truncf %50 : vector<8x128xf32> to vector<8x128xbf16>
    %c0_31 = arith.constant 0 : index
    %c0_32 = arith.constant 0 : index
    %52 = vector.load %arg2[%c0_31, %c0_32] : memref<128x512xbf16, #tpu.memory_space<vmem>>, vector<128x512xbf16>
    %cst_33 = arith.constant dense<0.000000e+00> : vector<8x512xf32>
    %53 = tpu.matmul %51, %52, %cst_33 {dimension_numbers = #tpu.dot_dimension_numbers<[1], [0], [0], [1], [0, 0, 1, 1], [], []>} : vector<8x128xbf16>, vector<128x512xbf16>, vector<8x512xf32> -> vector<8x512xf32>
    %54 = arith.addf %49, %53 : vector<8x512xf32>
    %55 = vector.extract_strided_slice %54 {offsets = [0, 0], sizes = [8, 128], strides = [1, 1]} : vector<8x512xf32> to vector<8x128xf32>
    %56 = arith.negf %55 : vector<8x128xf32>
    %57 = math.exp %56 : vector<8x128xf32>
    %cst_34 = arith.constant 1.000000e+00 : f32
    %58 = vector.broadcast %cst_34 : f32 to vector<8x128xf32>
    %59 = arith.addf %58, %57 : vector<8x128xf32>
    %60 = arith.divf %58, %59 : vector<8x128xf32>
    %61 = vector.extract_strided_slice %54 {offsets = [0, 128], sizes = [8, 128], strides = [1, 1]} : vector<8x512xf32> to vector<8x128xf32>
    %62 = arith.negf %61 : vector<8x128xf32>
    %63 = math.exp %62 : vector<8x128xf32>
    %cst_35 = arith.constant 1.000000e+00 : f32
    %64 = vector.broadcast %cst_35 : f32 to vector<8x128xf32>
    %65 = arith.addf %64, %63 : vector<8x128xf32>
    %66 = arith.divf %64, %65 : vector<8x128xf32>
    %67 = vector.extract_strided_slice %54 {offsets = [0, 256], sizes = [8, 128], strides = [1, 1]} : vector<8x512xf32> to vector<8x128xf32>
    %68 = math.tanh %67 : vector<8x128xf32>
    %69 = vector.extract_strided_slice %54 {offsets = [0, 384], sizes = [8, 128], strides = [1, 1]} : vector<8x512xf32> to vector<8x128xf32>
    %70 = arith.negf %69 : vector<8x128xf32>
    %71 = math.exp %70 : vector<8x128xf32>
    %cst_36 = arith.constant 1.000000e+00 : f32
    %72 = vector.broadcast %cst_36 : f32 to vector<8x128xf32>
    %73 = arith.addf %72, %71 : vector<8x128xf32>
    %74 = arith.divf %72, %73 : vector<8x128xf32>
    %c0_37 = arith.constant 0 : index
    %c0_38 = arith.constant 0 : index
    %75 = vector.load %arg7[%c0_37, %c0_38] : memref<8x128xf32, #tpu.memory_space<vmem>>, vector<8x128xf32>
    %76 = arith.mulf %66, %75 : vector<8x128xf32>
    %77 = arith.mulf %60, %68 : vector<8x128xf32>
    %78 = arith.addf %76, %77 : vector<8x128xf32>
    %79 = math.tanh %78 : vector<8x128xf32>
    %80 = arith.mulf %74, %79 : vector<8x128xf32>
    %c0_39 = arith.constant 0 : index
    %c0_40 = arith.constant 0 : index
    %81 = vector.load %arg7[%c0_39, %c0_40] : memref<8x128xf32, #tpu.memory_space<vmem>>, vector<8x128xf32>
    tpu.vector_store %arg7[%c0_39, %c0_40], %78 {strides = array<i32>} : memref<8x128xf32, #tpu.memory_space<vmem>>, vector<8x128xf32>,
    %c0_41 = arith.constant 0 : index
    %c0_42 = arith.constant 0 : index
    %82 = vector.load %arg6[%c0_41, %c0_42] : memref<8x128xf32, #tpu.memory_space<vmem>>, vector<8x128xf32>
    tpu.vector_store %arg6[%c0_41, %c0_42], %80 {strides = array<i32>} : memref<8x128xf32, #tpu.memory_space<vmem>>, vector<8x128xf32>,
    %c0_43 = arith.constant 0 : index
    %c0_44 = arith.constant 0 : index
    %83 = vector.load %arg8[%c0_43, %c0_44] : memref<8x128xf32, #tpu.memory_space<vmem>>, vector<8x128xf32>
    %84 = arith.addf %83, %80 : vector<8x128xf32>
    %c0_45 = arith.constant 0 : index
    %c0_46 = arith.constant 0 : index
    %85 = vector.load %arg8[%c0_45, %c0_46] : memref<8x128xf32, #tpu.memory_space<vmem>>, vector<8x128xf32>
    tpu.vector_store %arg8[%c0_45, %c0_46], %84 {strides = array<i32>} : memref<8x128xf32, #tpu.memory_space<vmem>>, vector<8x128xf32>,
    %c2_i32 = arith.constant 2 : i32
    %86 = arith.index_cast %c2_i32 : i32 to index
    %c0_47 = arith.constant 0 : index
    %c0_48 = arith.constant 0 : index
    %87 = vector.load %arg1[%86, %c0_47, %c0_48] : memref<8x8x512xbf16, #tpu.memory_space<vmem>>, vector<1x8x512xbf16>
    %88 = vector.shape_cast %87 : vector<1x8x512xbf16> to vector<8x512xbf16>
    %89 = arith.extf %88 : vector<8x512xbf16> to vector<8x512xf32>
    %c0_49 = arith.constant 0 : index
    %c0_50 = arith.constant 0 : index
    %90 = vector.load %arg6[%c0_49, %c0_50] : memref<8x128xf32, #tpu.memory_space<vmem>>, vector<8x128xf32>
    %91 = arith.truncf %90 : vector<8x128xf32> to vector<8x128xbf16>
    %c0_51 = arith.constant 0 : index
    %c0_52 = arith.constant 0 : index
    %92 = vector.load %arg2[%c0_51, %c0_52] : memref<128x512xbf16, #tpu.memory_space<vmem>>, vector<128x512xbf16>
    %cst_53 = arith.constant dense<0.000000e+00> : vector<8x512xf32>
    %93 = tpu.matmul %91, %92, %cst_53 {dimension_numbers = #tpu.dot_dimension_numbers<[1], [0], [0], [1], [0, 0, 1, 1], [], []>} : vector<8x128xbf16>, vector<128x512xbf16>, vector<8x512xf32> -> vector<8x512xf32>
    %94 = arith.addf %89, %93 : vector<8x512xf32>
    %95 = vector.extract_strided_slice %94 {offsets = [0, 0], sizes = [8, 128], strides = [1, 1]} : vector<8x512xf32> to vector<8x128xf32>
    %96 = arith.negf %95 : vector<8x128xf32>
    %97 = math.exp %96 : vector<8x128xf32>
    %cst_54 = arith.constant 1.000000e+00 : f32
    %98 = vector.broadcast %cst_54 : f32 to vector<8x128xf32>
    %99 = arith.addf %98, %97 : vector<8x128xf32>
    %100 = arith.divf %98, %99 : vector<8x128xf32>
    %101 = vector.extract_strided_slice %94 {offsets = [0, 128], sizes = [8, 128], strides = [1, 1]} : vector<8x512xf32> to vector<8x128xf32>
    %102 = arith.negf %101 : vector<8x128xf32>
    %103 = math.exp %102 : vector<8x128xf32>
    %cst_55 = arith.constant 1.000000e+00 : f32
    %104 = vector.broadcast %cst_55 : f32 to vector<8x128xf32>
    %105 = arith.addf %104, %103 : vector<8x128xf32>
    %106 = arith.divf %104, %105 : vector<8x128xf32>
    %107 = vector.extract_strided_slice %94 {offsets = [0, 256], sizes = [8, 128], strides = [1, 1]} : vector<8x512xf32> to vector<8x128xf32>
    %108 = math.tanh %107 : vector<8x128xf32>
    %109 = vector.extract_strided_slice %94 {offsets = [0, 384], sizes = [8, 128], strides = [1, 1]} : vector<8x512xf32> to vector<8x128xf32>
    %110 = arith.negf %109 : vector<8x128xf32>
    %111 = math.exp %110 : vector<8x128xf32>
    %cst_56 = arith.constant 1.000000e+00 : f32
    %112 = vector.broadcast %cst_56 : f32 to vector<8x128xf32>
    %113 = arith.addf %112, %111 : vector<8x128xf32>
    %114 = arith.divf %112, %113 : vector<8x128xf32>
    %c0_57 = arith.constant 0 : index
    %c0_58 = arith.constant 0 : index
    %115 = vector.load %arg7[%c0_57, %c0_58] : memref<8x128xf32, #tpu.memory_space<vmem>>, vector<8x128xf32>
    %116 = arith.mulf %106, %115 : vector<8x128xf32>
    %117 = arith.mulf %100, %108 : vector<8x128xf32>
    %118 = arith.addf %116, %117 : vector<8x128xf32>
    %119 = math.tanh %118 : vector<8x128xf32>
    %120 = arith.mulf %114, %119 : vector<8x128xf32>
    %c0_59 = arith.constant 0 : index
    %c0_60 = arith.constant 0 : index
    %121 = vector.load %arg7[%c0_59, %c0_60] : memref<8x128xf32, #tpu.memory_space<vmem>>, vector<8x128xf32>
    tpu.vector_store %arg7[%c0_59, %c0_60], %118 {strides = array<i32>} : memref<8x128xf32, #tpu.memory_space<vmem>>, vector<8x128xf32>,
    %c0_61 = arith.constant 0 : index
    %c0_62 = arith.constant 0 : index
    %122 = vector.load %arg6[%c0_61, %c0_62] : memref<8x128xf32, #tpu.memory_space<vmem>>, vector<8x128xf32>
    tpu.vector_store %arg6[%c0_61, %c0_62], %120 {strides = array<i32>} : memref<8x128xf32, #tpu.memory_space<vmem>>, vector<8x128xf32>,
    %c0_63 = arith.constant 0 : index
    %c0_64 = arith.constant 0 : index
    %123 = vector.load %arg8[%c0_63, %c0_64] : memref<8x128xf32, #tpu.memory_space<vmem>>, vector<8x128xf32>
    %124 = arith.addf %123, %120 : vector<8x128xf32>
    %c0_65 = arith.constant 0 : index
    %c0_66 = arith.constant 0 : index
    %125 = vector.load %arg8[%c0_65, %c0_66] : memref<8x128xf32, #tpu.memory_space<vmem>>, vector<8x128xf32>
    tpu.vector_store %arg8[%c0_65, %c0_66], %124 {strides = array<i32>} : memref<8x128xf32, #tpu.memory_space<vmem>>, vector<8x128xf32>,
    %c3_i32 = arith.constant 3 : i32
    %126 = arith.index_cast %c3_i32 : i32 to index
    %c0_67 = arith.constant 0 : index
    %c0_68 = arith.constant 0 : index
    %127 = vector.load %arg1[%126, %c0_67, %c0_68] : memref<8x8x512xbf16, #tpu.memory_space<vmem>>, vector<1x8x512xbf16>
    %128 = vector.shape_cast %127 : vector<1x8x512xbf16> to vector<8x512xbf16>
    %129 = arith.extf %128 : vector<8x512xbf16> to vector<8x512xf32>
    %c0_69 = arith.constant 0 : index
    %c0_70 = arith.constant 0 : index
    %130 = vector.load %arg6[%c0_69, %c0_70] : memref<8x128xf32, #tpu.memory_space<vmem>>, vector<8x128xf32>
    %131 = arith.truncf %130 : vector<8x128xf32> to vector<8x128xbf16>
    %c0_71 = arith.constant 0 : index
    %c0_72 = arith.constant 0 : index
    %132 = vector.load %arg2[%c0_71, %c0_72] : memref<128x512xbf16, #tpu.memory_space<vmem>>, vector<128x512xbf16>
    %cst_73 = arith.constant dense<0.000000e+00> : vector<8x512xf32>
    %133 = tpu.matmul %131, %132, %cst_73 {dimension_numbers = #tpu.dot_dimension_numbers<[1], [0], [0], [1], [0, 0, 1, 1], [], []>} : vector<8x128xbf16>, vector<128x512xbf16>, vector<8x512xf32> -> vector<8x512xf32>
    %134 = arith.addf %129, %133 : vector<8x512xf32>
    %135 = vector.extract_strided_slice %134 {offsets = [0, 0], sizes = [8, 128], strides = [1, 1]} : vector<8x512xf32> to vector<8x128xf32>
    %136 = arith.negf %135 : vector<8x128xf32>
    %137 = math.exp %136 : vector<8x128xf32>
    %cst_74 = arith.constant 1.000000e+00 : f32
    %138 = vector.broadcast %cst_74 : f32 to vector<8x128xf32>
    %139 = arith.addf %138, %137 : vector<8x128xf32>
    %140 = arith.divf %138, %139 : vector<8x128xf32>
    %141 = vector.extract_strided_slice %134 {offsets = [0, 128], sizes = [8, 128], strides = [1, 1]} : vector<8x512xf32> to vector<8x128xf32>
    %142 = arith.negf %141 : vector<8x128xf32>
    %143 = math.exp %142 : vector<8x128xf32>
    %cst_75 = arith.constant 1.000000e+00 : f32
    %144 = vector.broadcast %cst_75 : f32 to vector<8x128xf32>
    %145 = arith.addf %144, %143 : vector<8x128xf32>
    %146 = arith.divf %144, %145 : vector<8x128xf32>
    %147 = vector.extract_strided_slice %134 {offsets = [0, 256], sizes = [8, 128], strides = [1, 1]} : vector<8x512xf32> to vector<8x128xf32>
    %148 = math.tanh %147 : vector<8x128xf32>
    %149 = vector.extract_strided_slice %134 {offsets = [0, 384], sizes = [8, 128], strides = [1, 1]} : vector<8x512xf32> to vector<8x128xf32>
    %150 = arith.negf %149 : vector<8x128xf32>
    %151 = math.exp %150 : vector<8x128xf32>
    %cst_76 = arith.constant 1.000000e+00 : f32
    %152 = vector.broadcast %cst_76 : f32 to vector<8x128xf32>
    %153 = arith.addf %152, %151 : vector<8x128xf32>
    %154 = arith.divf %152, %153 : vector<8x128xf32>
    %c0_77 = arith.constant 0 : index
    %c0_78 = arith.constant 0 : index
    %155 = vector.load %arg7[%c0_77, %c0_78] : memref<8x128xf32, #tpu.memory_space<vmem>>, vector<8x128xf32>
    %156 = arith.mulf %146, %155 : vector<8x128xf32>
    %157 = arith.mulf %140, %148 : vector<8x128xf32>
    %158 = arith.addf %156, %157 : vector<8x128xf32>
    %159 = math.tanh %158 : vector<8x128xf32>
    %160 = arith.mulf %154, %159 : vector<8x128xf32>
    %c0_79 = arith.constant 0 : index
    %c0_80 = arith.constant 0 : index
    %161 = vector.load %arg7[%c0_79, %c0_80] : memref<8x128xf32, #tpu.memory_space<vmem>>, vector<8x128xf32>
    tpu.vector_store %arg7[%c0_79, %c0_80], %158 {strides = array<i32>} : memref<8x128xf32, #tpu.memory_space<vmem>>, vector<8x128xf32>,
    %c0_81 = arith.constant 0 : index
    %c0_82 = arith.constant 0 : index
    %162 = vector.load %arg6[%c0_81, %c0_82] : memref<8x128xf32, #tpu.memory_space<vmem>>, vector<8x128xf32>
    tpu.vector_store %arg6[%c0_81, %c0_82], %160 {strides = array<i32>} : memref<8x128xf32, #tpu.memory_space<vmem>>, vector<8x128xf32>,
    %c0_83 = arith.constant 0 : index
    %c0_84 = arith.constant 0 : index
    %163 = vector.load %arg8[%c0_83, %c0_84] : memref<8x128xf32, #tpu.memory_space<vmem>>, vector<8x128xf32>
    %164 = arith.addf %163, %160 : vector<8x128xf32>
    %c0_85 = arith.constant 0 : index
    %c0_86 = arith.constant 0 : index
    %165 = vector.load %arg8[%c0_85, %c0_86] : memref<8x128xf32, #tpu.memory_space<vmem>>, vector<8x128xf32>
    tpu.vector_store %arg8[%c0_85, %c0_86], %164 {strides = array<i32>} : memref<8x128xf32, #tpu.memory_space<vmem>>, vector<8x128xf32>,
    %c4_i32 = arith.constant 4 : i32
    %166 = arith.index_cast %c4_i32 : i32 to index
    %c0_87 = arith.constant 0 : index
    %c0_88 = arith.constant 0 : index
    %167 = vector.load %arg1[%166, %c0_87, %c0_88] : memref<8x8x512xbf16, #tpu.memory_space<vmem>>, vector<1x8x512xbf16>
    %168 = vector.shape_cast %167 : vector<1x8x512xbf16> to vector<8x512xbf16>
    %169 = arith.extf %168 : vector<8x512xbf16> to vector<8x512xf32>
    %c0_89 = arith.constant 0 : index
    %c0_90 = arith.constant 0 : index
    %170 = vector.load %arg6[%c0_89, %c0_90] : memref<8x128xf32, #tpu.memory_space<vmem>>, vector<8x128xf32>
    %171 = arith.truncf %170 : vector<8x128xf32> to vector<8x128xbf16>
    %c0_91 = arith.constant 0 : index
    %c0_92 = arith.constant 0 : index
    %172 = vector.load %arg2[%c0_91, %c0_92] : memref<128x512xbf16, #tpu.memory_space<vmem>>, vector<128x512xbf16>
    %cst_93 = arith.constant dense<0.000000e+00> : vector<8x512xf32>
    %173 = tpu.matmul %171, %172, %cst_93 {dimension_numbers = #tpu.dot_dimension_numbers<[1], [0], [0], [1], [0, 0, 1, 1], [], []>} : vector<8x128xbf16>, vector<128x512xbf16>, vector<8x512xf32> -> vector<8x512xf32>
    %174 = arith.addf %169, %173 : vector<8x512xf32>
    %175 = vector.extract_strided_slice %174 {offsets = [0, 0], sizes = [8, 128], strides = [1, 1]} : vector<8x512xf32> to vector<8x128xf32>
    %176 = arith.negf %175 : vector<8x128xf32>
    %177 = math.exp %176 : vector<8x128xf32>
    %cst_94 = arith.constant 1.000000e+00 : f32
    %178 = vector.broadcast %cst_94 : f32 to vector<8x128xf32>
    %179 = arith.addf %178, %177 : vector<8x128xf32>
    %180 = arith.divf %178, %179 : vector<8x128xf32>
    %181 = vector.extract_strided_slice %174 {offsets = [0, 128], sizes = [8, 128], strides = [1, 1]} : vector<8x512xf32> to vector<8x128xf32>
    %182 = arith.negf %181 : vector<8x128xf32>
    %183 = math.exp %182 : vector<8x128xf32>
    %cst_95 = arith.constant 1.000000e+00 : f32
    %184 = vector.broadcast %cst_95 : f32 to vector<8x128xf32>
    %185 = arith.addf %184, %183 : vector<8x128xf32>
    %186 = arith.divf %184, %185 : vector<8x128xf32>
    %187 = vector.extract_strided_slice %174 {offsets = [0, 256], sizes = [8, 128], strides = [1, 1]} : vector<8x512xf32> to vector<8x128xf32>
    %188 = math.tanh %187 : vector<8x128xf32>
    %189 = vector.extract_strided_slice %174 {offsets = [0, 384], sizes = [8, 128], strides = [1, 1]} : vector<8x512xf32> to vector<8x128xf32>
    %190 = arith.negf %189 : vector<8x128xf32>
    %191 = math.exp %190 : vector<8x128xf32>
    %cst_96 = arith.constant 1.000000e+00 : f32
    %192 = vector.broadcast %cst_96 : f32 to vector<8x128xf32>
    %193 = arith.addf %192, %191 : vector<8x128xf32>
    %194 = arith.divf %192, %193 : vector<8x128xf32>
    %c0_97 = arith.constant 0 : index
    %c0_98 = arith.constant 0 : index
    %195 = vector.load %arg7[%c0_97, %c0_98] : memref<8x128xf32, #tpu.memory_space<vmem>>, vector<8x128xf32>
    %196 = arith.mulf %186, %195 : vector<8x128xf32>
    %197 = arith.mulf %180, %188 : vector<8x128xf32>
    %198 = arith.addf %196, %197 : vector<8x128xf32>
    %199 = math.tanh %198 : vector<8x128xf32>
    %200 = arith.mulf %194, %199 : vector<8x128xf32>
    %c0_99 = arith.constant 0 : index
    %c0_100 = arith.constant 0 : index
    %201 = vector.load %arg7[%c0_99, %c0_100] : memref<8x128xf32, #tpu.memory_space<vmem>>, vector<8x128xf32>
    tpu.vector_store %arg7[%c0_99, %c0_100], %198 {strides = array<i32>} : memref<8x128xf32, #tpu.memory_space<vmem>>, vector<8x128xf32>,
    %c0_101 = arith.constant 0 : index
    %c0_102 = arith.constant 0 : index
    %202 = vector.load %arg6[%c0_101, %c0_102] : memref<8x128xf32, #tpu.memory_space<vmem>>, vector<8x128xf32>
    tpu.vector_store %arg6[%c0_101, %c0_102], %200 {strides = array<i32>} : memref<8x128xf32, #tpu.memory_space<vmem>>, vector<8x128xf32>,
    %c0_103 = arith.constant 0 : index
    %c0_104 = arith.constant 0 : index
    %203 = vector.load %arg8[%c0_103, %c0_104] : memref<8x128xf32, #tpu.memory_space<vmem>>, vector<8x128xf32>
    %204 = arith.addf %203, %200 : vector<8x128xf32>
    %c0_105 = arith.constant 0 : index
    %c0_106 = arith.constant 0 : index
    %205 = vector.load %arg8[%c0_105, %c0_106] : memref<8x128xf32, #tpu.memory_space<vmem>>, vector<8x128xf32>
    tpu.vector_store %arg8[%c0_105, %c0_106], %204 {strides = array<i32>} : memref<8x128xf32, #tpu.memory_space<vmem>>, vector<8x128xf32>,
    %c5_i32 = arith.constant 5 : i32
    %206 = arith.index_cast %c5_i32 : i32 to index
    %c0_107 = arith.constant 0 : index
    %c0_108 = arith.constant 0 : index
    %207 = vector.load %arg1[%206, %c0_107, %c0_108] : memref<8x8x512xbf16, #tpu.memory_space<vmem>>, vector<1x8x512xbf16>
    %208 = vector.shape_cast %207 : vector<1x8x512xbf16> to vector<8x512xbf16>
    %209 = arith.extf %208 : vector<8x512xbf16> to vector<8x512xf32>
    %c0_109 = arith.constant 0 : index
    %c0_110 = arith.constant 0 : index
    %210 = vector.load %arg6[%c0_109, %c0_110] : memref<8x128xf32, #tpu.memory_space<vmem>>, vector<8x128xf32>
    %211 = arith.truncf %210 : vector<8x128xf32> to vector<8x128xbf16>
    %c0_111 = arith.constant 0 : index
    %c0_112 = arith.constant 0 : index
    %212 = vector.load %arg2[%c0_111, %c0_112] : memref<128x512xbf16, #tpu.memory_space<vmem>>, vector<128x512xbf16>
    %cst_113 = arith.constant dense<0.000000e+00> : vector<8x512xf32>
    %213 = tpu.matmul %211, %212, %cst_113 {dimension_numbers = #tpu.dot_dimension_numbers<[1], [0], [0], [1], [0, 0, 1, 1], [], []>} : vector<8x128xbf16>, vector<128x512xbf16>, vector<8x512xf32> -> vector<8x512xf32>
    %214 = arith.addf %209, %213 : vector<8x512xf32>
    %215 = vector.extract_strided_slice %214 {offsets = [0, 0], sizes = [8, 128], strides = [1, 1]} : vector<8x512xf32> to vector<8x128xf32>
    %216 = arith.negf %215 : vector<8x128xf32>
    %217 = math.exp %216 : vector<8x128xf32>
    %cst_114 = arith.constant 1.000000e+00 : f32
    %218 = vector.broadcast %cst_114 : f32 to vector<8x128xf32>
    %219 = arith.addf %218, %217 : vector<8x128xf32>
    %220 = arith.divf %218, %219 : vector<8x128xf32>
    %221 = vector.extract_strided_slice %214 {offsets = [0, 128], sizes = [8, 128], strides = [1, 1]} : vector<8x512xf32> to vector<8x128xf32>
    %222 = arith.negf %221 : vector<8x128xf32>
    %223 = math.exp %222 : vector<8x128xf32>
    %cst_115 = arith.constant 1.000000e+00 : f32
    %224 = vector.broadcast %cst_115 : f32 to vector<8x128xf32>
    %225 = arith.addf %224, %223 : vector<8x128xf32>
    %226 = arith.divf %224, %225 : vector<8x128xf32>
    %227 = vector.extract_strided_slice %214 {offsets = [0, 256], sizes = [8, 128], strides = [1, 1]} : vector<8x512xf32> to vector<8x128xf32>
    %228 = math.tanh %227 : vector<8x128xf32>
    %229 = vector.extract_strided_slice %214 {offsets = [0, 384], sizes = [8, 128], strides = [1, 1]} : vector<8x512xf32> to vector<8x128xf32>
    %230 = arith.negf %229 : vector<8x128xf32>
    %231 = math.exp %230 : vector<8x128xf32>
    %cst_116 = arith.constant 1.000000e+00 : f32
    %232 = vector.broadcast %cst_116 : f32 to vector<8x128xf32>
    %233 = arith.addf %232, %231 : vector<8x128xf32>
    %234 = arith.divf %232, %233 : vector<8x128xf32>
    %c0_117 = arith.constant 0 : index
    %c0_118 = arith.constant 0 : index
    %235 = vector.load %arg7[%c0_117, %c0_118] : memref<8x128xf32, #tpu.memory_space<vmem>>, vector<8x128xf32>
    %236 = arith.mulf %226, %235 : vector<8x128xf32>
    %237 = arith.mulf %220, %228 : vector<8x128xf32>
    %238 = arith.addf %236, %237 : vector<8x128xf32>
    %239 = math.tanh %238 : vector<8x128xf32>
    %240 = arith.mulf %234, %239 : vector<8x128xf32>
    %c0_119 = arith.constant 0 : index
    %c0_120 = arith.constant 0 : index
    %241 = vector.load %arg7[%c0_119, %c0_120] : memref<8x128xf32, #tpu.memory_space<vmem>>, vector<8x128xf32>
    tpu.vector_store %arg7[%c0_119, %c0_120], %238 {strides = array<i32>} : memref<8x128xf32, #tpu.memory_space<vmem>>, vector<8x128xf32>,
    %c0_121 = arith.constant 0 : index
    %c0_122 = arith.constant 0 : index
    %242 = vector.load %arg6[%c0_121, %c0_122] : memref<8x128xf32, #tpu.memory_space<vmem>>, vector<8x128xf32>
    tpu.vector_store %arg6[%c0_121, %c0_122], %240 {strides = array<i32>} : memref<8x128xf32, #tpu.memory_space<vmem>>, vector<8x128xf32>,
    %c0_123 = arith.constant 0 : index
    %c0_124 = arith.constant 0 : index
    %243 = vector.load %arg8[%c0_123, %c0_124] : memref<8x128xf32, #tpu.memory_space<vmem>>, vector<8x128xf32>
    %244 = arith.addf %243, %240 : vector<8x128xf32>
    %c0_125 = arith.constant 0 : index
    %c0_126 = arith.constant 0 : index
    %245 = vector.load %arg8[%c0_125, %c0_126] : memref<8x128xf32, #tpu.memory_space<vmem>>, vector<8x128xf32>
    tpu.vector_store %arg8[%c0_125, %c0_126], %244 {strides = array<i32>} : memref<8x128xf32, #tpu.memory_space<vmem>>, vector<8x128xf32>,
    %c6_i32 = arith.constant 6 : i32
    %246 = arith.index_cast %c6_i32 : i32 to index
    %c0_127 = arith.constant 0 : index
    %c0_128 = arith.constant 0 : index
    %247 = vector.load %arg1[%246, %c0_127, %c0_128] : memref<8x8x512xbf16, #tpu.memory_space<vmem>>, vector<1x8x512xbf16>
    %248 = vector.shape_cast %247 : vector<1x8x512xbf16> to vector<8x512xbf16>
    %249 = arith.extf %248 : vector<8x512xbf16> to vector<8x512xf32>
    %c0_129 = arith.constant 0 : index
    %c0_130 = arith.constant 0 : index
    %250 = vector.load %arg6[%c0_129, %c0_130] : memref<8x128xf32, #tpu.memory_space<vmem>>, vector<8x128xf32>
    %251 = arith.truncf %250 : vector<8x128xf32> to vector<8x128xbf16>
    %c0_131 = arith.constant 0 : index
    %c0_132 = arith.constant 0 : index
    %252 = vector.load %arg2[%c0_131, %c0_132] : memref<128x512xbf16, #tpu.memory_space<vmem>>, vector<128x512xbf16>
    %cst_133 = arith.constant dense<0.000000e+00> : vector<8x512xf32>
    %253 = tpu.matmul %251, %252, %cst_133 {dimension_numbers = #tpu.dot_dimension_numbers<[1], [0], [0], [1], [0, 0, 1, 1], [], []>} : vector<8x128xbf16>, vector<128x512xbf16>, vector<8x512xf32> -> vector<8x512xf32>
    %254 = arith.addf %249, %253 : vector<8x512xf32>
    %255 = vector.extract_strided_slice %254 {offsets = [0, 0], sizes = [8, 128], strides = [1, 1]} : vector<8x512xf32> to vector<8x128xf32>
    %256 = arith.negf %255 : vector<8x128xf32>
    %257 = math.exp %256 : vector<8x128xf32>
    %cst_134 = arith.constant 1.000000e+00 : f32
    %258 = vector.broadcast %cst_134 : f32 to vector<8x128xf32>
    %259 = arith.addf %258, %257 : vector<8x128xf32>
    %260 = arith.divf %258, %259 : vector<8x128xf32>
    %261 = vector.extract_strided_slice %254 {offsets = [0, 128], sizes = [8, 128], strides = [1, 1]} : vector<8x512xf32> to vector<8x128xf32>
    %262 = arith.negf %261 : vector<8x128xf32>
    %263 = math.exp %262 : vector<8x128xf32>
    %cst_135 = arith.constant 1.000000e+00 : f32
    %264 = vector.broadcast %cst_135 : f32 to vector<8x128xf32>
    %265 = arith.addf %264, %263 : vector<8x128xf32>
    %266 = arith.divf %264, %265 : vector<8x128xf32>
    %267 = vector.extract_strided_slice %254 {offsets = [0, 256], sizes = [8, 128], strides = [1, 1]} : vector<8x512xf32> to vector<8x128xf32>
    %268 = math.tanh %267 : vector<8x128xf32>
    %269 = vector.extract_strided_slice %254 {offsets = [0, 384], sizes = [8, 128], strides = [1, 1]} : vector<8x512xf32> to vector<8x128xf32>
    %270 = arith.negf %269 : vector<8x128xf32>
    %271 = math.exp %270 : vector<8x128xf32>
    %cst_136 = arith.constant 1.000000e+00 : f32
    %272 = vector.broadcast %cst_136 : f32 to vector<8x128xf32>
    %273 = arith.addf %272, %271 : vector<8x128xf32>
    %274 = arith.divf %272, %273 : vector<8x128xf32>
    %c0_137 = arith.constant 0 : index
    %c0_138 = arith.constant 0 : index
    %275 = vector.load %arg7[%c0_137, %c0_138] : memref<8x128xf32, #tpu.memory_space<vmem>>, vector<8x128xf32>
    %276 = arith.mulf %266, %275 : vector<8x128xf32>
    %277 = arith.mulf %260, %268 : vector<8x128xf32>
    %278 = arith.addf %276, %277 : vector<8x128xf32>
    %279 = math.tanh %278 : vector<8x128xf32>
    %280 = arith.mulf %274, %279 : vector<8x128xf32>
    %c0_139 = arith.constant 0 : index
    %c0_140 = arith.constant 0 : index
    %281 = vector.load %arg7[%c0_139, %c0_140] : memref<8x128xf32, #tpu.memory_space<vmem>>, vector<8x128xf32>
    tpu.vector_store %arg7[%c0_139, %c0_140], %278 {strides = array<i32>} : memref<8x128xf32, #tpu.memory_space<vmem>>, vector<8x128xf32>,
    %c0_141 = arith.constant 0 : index
    %c0_142 = arith.constant 0 : index
    %282 = vector.load %arg6[%c0_141, %c0_142] : memref<8x128xf32, #tpu.memory_space<vmem>>, vector<8x128xf32>
    tpu.vector_store %arg6[%c0_141, %c0_142], %280 {strides = array<i32>} : memref<8x128xf32, #tpu.memory_space<vmem>>, vector<8x128xf32>,
    %c0_143 = arith.constant 0 : index
    %c0_144 = arith.constant 0 : index
    %283 = vector.load %arg8[%c0_143, %c0_144] : memref<8x128xf32, #tpu.memory_space<vmem>>, vector<8x128xf32>
    %284 = arith.addf %283, %280 : vector<8x128xf32>
    %c0_145 = arith.constant 0 : index
    %c0_146 = arith.constant 0 : index
    %285 = vector.load %arg8[%c0_145, %c0_146] : memref<8x128xf32, #tpu.memory_space<vmem>>, vector<8x128xf32>
    tpu.vector_store %arg8[%c0_145, %c0_146], %284 {strides = array<i32>} : memref<8x128xf32, #tpu.memory_space<vmem>>, vector<8x128xf32>,
    %c7_i32 = arith.constant 7 : i32
    %286 = arith.index_cast %c7_i32 : i32 to index
    %c0_147 = arith.constant 0 : index
    %c0_148 = arith.constant 0 : index
    %287 = vector.load %arg1[%286, %c0_147, %c0_148] : memref<8x8x512xbf16, #tpu.memory_space<vmem>>, vector<1x8x512xbf16>
    %288 = vector.shape_cast %287 : vector<1x8x512xbf16> to vector<8x512xbf16>
    %289 = arith.extf %288 : vector<8x512xbf16> to vector<8x512xf32>
    %c0_149 = arith.constant 0 : index
    %c0_150 = arith.constant 0 : index
    %290 = vector.load %arg6[%c0_149, %c0_150] : memref<8x128xf32, #tpu.memory_space<vmem>>, vector<8x128xf32>
    %291 = arith.truncf %290 : vector<8x128xf32> to vector<8x128xbf16>
    %c0_151 = arith.constant 0 : index
    %c0_152 = arith.constant 0 : index
    %292 = vector.load %arg2[%c0_151, %c0_152] : memref<128x512xbf16, #tpu.memory_space<vmem>>, vector<128x512xbf16>
    %cst_153 = arith.constant dense<0.000000e+00> : vector<8x512xf32>
    %293 = tpu.matmul %291, %292, %cst_153 {dimension_numbers = #tpu.dot_dimension_numbers<[1], [0], [0], [1], [0, 0, 1, 1], [], []>} : vector<8x128xbf16>, vector<128x512xbf16>, vector<8x512xf32> -> vector<8x512xf32>
    %294 = arith.addf %289, %293 : vector<8x512xf32>
    %295 = vector.extract_strided_slice %294 {offsets = [0, 0], sizes = [8, 128], strides = [1, 1]} : vector<8x512xf32> to vector<8x128xf32>
    %296 = arith.negf %295 : vector<8x128xf32>
    %297 = math.exp %296 : vector<8x128xf32>
    %cst_154 = arith.constant 1.000000e+00 : f32
    %298 = vector.broadcast %cst_154 : f32 to vector<8x128xf32>
    %299 = arith.addf %298, %297 : vector<8x128xf32>
    %300 = arith.divf %298, %299 : vector<8x128xf32>
    %301 = vector.extract_strided_slice %294 {offsets = [0, 128], sizes = [8, 128], strides = [1, 1]} : vector<8x512xf32> to vector<8x128xf32>
    %302 = arith.negf %301 : vector<8x128xf32>
    %303 = math.exp %302 : vector<8x128xf32>
    %cst_155 = arith.constant 1.000000e+00 : f32
    %304 = vector.broadcast %cst_155 : f32 to vector<8x128xf32>
    %305 = arith.addf %304, %303 : vector<8x128xf32>
    %306 = arith.divf %304, %305 : vector<8x128xf32>
    %307 = vector.extract_strided_slice %294 {offsets = [0, 256], sizes = [8, 128], strides = [1, 1]} : vector<8x512xf32> to vector<8x128xf32>
    %308 = math.tanh %307 : vector<8x128xf32>
    %309 = vector.extract_strided_slice %294 {offsets = [0, 384], sizes = [8, 128], strides = [1, 1]} : vector<8x512xf32> to vector<8x128xf32>
    %310 = arith.negf %309 : vector<8x128xf32>
    %311 = math.exp %310 : vector<8x128xf32>
    %cst_156 = arith.constant 1.000000e+00 : f32
    %312 = vector.broadcast %cst_156 : f32 to vector<8x128xf32>
    %313 = arith.addf %312, %311 : vector<8x128xf32>
    %314 = arith.divf %312, %313 : vector<8x128xf32>
    %c0_157 = arith.constant 0 : index
    %c0_158 = arith.constant 0 : index
    %315 = vector.load %arg7[%c0_157, %c0_158] : memref<8x128xf32, #tpu.memory_space<vmem>>, vector<8x128xf32>
    %316 = arith.mulf %306, %315 : vector<8x128xf32>
    %317 = arith.mulf %300, %308 : vector<8x128xf32>
    %318 = arith.addf %316, %317 : vector<8x128xf32>
    %319 = math.tanh %318 : vector<8x128xf32>
    %320 = arith.mulf %314, %319 : vector<8x128xf32>
    %c0_159 = arith.constant 0 : index
    %c0_160 = arith.constant 0 : index
    %321 = vector.load %arg7[%c0_159, %c0_160] : memref<8x128xf32, #tpu.memory_space<vmem>>, vector<8x128xf32>
    tpu.vector_store %arg7[%c0_159, %c0_160], %318 {strides = array<i32>} : memref<8x128xf32, #tpu.memory_space<vmem>>, vector<8x128xf32>,
    %c0_161 = arith.constant 0 : index
    %c0_162 = arith.constant 0 : index
    %322 = vector.load %arg6[%c0_161, %c0_162] : memref<8x128xf32, #tpu.memory_space<vmem>>, vector<8x128xf32>
    tpu.vector_store %arg6[%c0_161, %c0_162], %320 {strides = array<i32>} : memref<8x128xf32, #tpu.memory_space<vmem>>, vector<8x128xf32>,
    %c0_163 = arith.constant 0 : index
    %c0_164 = arith.constant 0 : index
    %323 = vector.load %arg8[%c0_163, %c0_164] : memref<8x128xf32, #tpu.memory_space<vmem>>, vector<8x128xf32>
    %324 = arith.addf %323, %320 : vector<8x128xf32>
    %c0_165 = arith.constant 0 : index
    %c0_166 = arith.constant 0 : index
    %325 = vector.load %arg8[%c0_165, %c0_166] : memref<8x128xf32, #tpu.memory_space<vmem>>, vector<8x128xf32>
    tpu.vector_store %arg8[%c0_165, %c0_166], %324 {strides = array<i32>} : memref<8x128xf32, #tpu.memory_space<vmem>>, vector<8x128xf32>,
    %c8_i32 = arith.constant 8 : i32
    %c0_167 = arith.constant 0 : index
    %c0_168 = arith.constant 0 : index
    %326 = vector.load %arg8[%c0_167, %c0_168] : memref<8x128xf32, #tpu.memory_space<vmem>>, vector<8x128xf32>
    %cst_169 = arith.constant 1.250000e-01 : f32
    %327 = vector.broadcast %cst_169 : f32 to vector<8x128xf32>
    %328 = arith.mulf %326, %327 : vector<8x128xf32>
    %329 = arith.truncf %328 : vector<8x128xf32> to vector<8x128xbf16>
    %c0_170 = arith.constant 0 : index
    %c0_171 = arith.constant 0 : index
    %330 = vector.load %arg3[%c0_170, %c0_171] : memref<128x128xbf16, #tpu.memory_space<vmem>>, vector<128x128xbf16>
    %cst_172 = arith.constant dense<0.000000e+00> : vector<8x128xf32>
    %331 = tpu.matmul %329, %330, %cst_172 {dimension_numbers = #tpu.dot_dimension_numbers<[1], [0], [0], [1], [0, 0, 1, 1], [], []>} : vector<8x128xbf16>, vector<128x128xbf16>, vector<8x128xf32> -> vector<8x128xf32>
    %c0_173 = arith.constant 0 : index
    %c0_174 = arith.constant 0 : index
    %332 = vector.load %arg4[%c0_173, %c0_174] : memref<1x128xf32, #tpu.memory_space<vmem>>, vector<1x128xf32>
    %333 = vector.broadcast %332 : vector<1x128xf32> to vector<8x128xf32>
    %334 = arith.addf %331, %333 : vector<8x128xf32>
    %c0_175 = arith.constant 0 : index
    %c0_176 = arith.constant 0 : index
    %335 = vector.load %arg5[%c0_175, %c0_176] : memref<8x128xf32, #tpu.memory_space<vmem>>, vector<8x128xf32>
    tpu.vector_store %arg5[%c0_175, %c0_176], %334 {strides = array<i32>} : memref<8x128xf32, #tpu.memory_space<vmem>>, vector<8x128xf32>,
    return
  }
  func.func @transform_0(%arg0: i32) -> (i32, i32, i32) {
    %c0_i32 = arith.constant 0 : i32
    %c0_i32_0 = arith.constant 0 : i32
    %c0_i32_1 = arith.constant 0 : i32
    return %c0_i32, %arg0, %c0_i32_0 : i32, i32, i32
  }
  func.func @transform_1(%arg0: i32) -> (i32, i32) {
    %c0_i32 = arith.constant 0 : i32
    %c0_i32_0 = arith.constant 0 : i32
    %c0_i32_1 = arith.constant 0 : i32
    return %c0_i32, %c0_i32_0 : i32, i32
  }
  func.func @transform_2(%arg0: i32) -> (i32, i32) {
    %c0_i32 = arith.constant 0 : i32
    %c0_i32_0 = arith.constant 0 : i32
    %c0_i32_1 = arith.constant 0 : i32
    return %c0_i32, %c0_i32_0 : i32, i32
  }
  func.func @transform_3(%arg0: i32) -> (i32, i32) {
    %c0_i32 = arith.constant 0 : i32
    %c0_i32_0 = arith.constant 0 : i32
    %c0_i32_1 = arith.constant 0 : i32
    return %c0_i32, %c0_i32_0 : i32, i32
  }
  func.func @transform_4(%arg0: i32) -> (i32, i32) {
    %c0_i32 = arith.constant 0 : i32
    %c0_i32_0 = arith.constant 0 : i32
    return %arg0, %c0_i32 : i32, i32
  }
}

</mosaic_0001>

<bundles_post_ra>
// kernel: rnn_model_forward.1
= control target key start
LH: loop header
LB: loop body
LE: loop exit
PB: predicated region body
PF: predicated region fallthrough
CT: control target
= control target key end

     0   :  { %v3243_v1 = vmov 0   ;;  %v3244_v33 = vmov 0.0|0.0   ;;  %vm3246_vm0 = vmmov 0   ;;  %s3995_s1 = inlined_call_operand.vmem [shape: bf16[128,512], index: 1, kind: input, shape index: {}]   ;;  %s3996_s0 = inlined_call_operand.vmem [shape: bf16[8,8,512], index: 0, kind: input, shape index: {}]   ;;  %s3997_s2 = inlined_call_operand.vmem [shape: bf16[128,128], index: 2, kind: input, shape index: {}]   ;;  %s3998_s3 = inlined_call_operand.vmem [shape: f32[1,128], index: 3, kind: input, shape index: {}]   ;;  %s3999_s4 = inlined_call_operand.vmem [shape: f32[8,128], index: 4, kind: output, shape index: {}]  }
   0x1   :  { %v3275_v0 = vld [vmem:[%s3995_s1 + $0xe4] ss:$16 sps:$4 sm:$0xff]   ;;  %253 = vmatprep.mubr.bf16.mxu0 %v3243_v1  ;;  %294 = vmatprep.mubr.bf16.mxu1 %v3243_v1  ;;  %v3282_v2 = vld [vmem:[%s3995_s1 + $0xe0] ss:$16 sps:$4 sm:$0xff]   ;;  %v3305_v6 = vld [vmem:[%s3995_s1 + $0xec] ss:$16 sps:$4 sm:$0xff]  }
   0x2   :  { %221 = vmatprep.subr.bf16.mxu0 %v3275_v0  ;;  %v3288_v3 = vld [vmem:[%s3995_s1 + $0xc4] ss:$16 sps:$4 sm:$0xff]   ;;  %v3294_v4 = vld [vmem:[%s3995_s1 + $0xc0] ss:$16 sps:$4 sm:$0xff]   ;;  %v3310_v7 = vld [vmem:[%s3995_s1 + $0xe8] ss:$16 sps:$4 sm:$0xff]   ;;  %262 = vmatprep.subr.bf16.mxu1 %v3305_v6 }
   0x3   :  { %222 = vmatpush1.bf16.msra.mxu0 %v3282_v2  ;;  %v3300_v5 = vld [vmem:[%s3995_s1 + $0xa4] ss:$16 sps:$4 sm:$0xff]   ;;  %v3316_v8 = vld [vmem:[%s3995_s1 + $0xa0] ss:$16 sps:$4 sm:$0xff]   ;;  %263 = vmatpush1.bf16.msra.mxu1 %v3310_v7  ;;  %v3329_v10 = vld [vmem:[%s3995_s1 + $0xcc] ss:$16 sps:$4 sm:$0xff]  }
   0x4   :  { %223 = vmatprep.subr.bf16.mxu0 %v3288_v3  ;;  %v3323_v9 = vld [vmem:[%s3995_s1 + $0x84] ss:$16 sps:$4 sm:$0xff]   ;;  %v3334_v11 = vld [vmem:[%s3995_s1 + $0xc8] ss:$16 sps:$4 sm:$0xff]   ;;  %264 = vmatprep.subr.bf16.mxu1 %v3329_v10  ;;  %v3341_v12 = vld [vmem:[%s3995_s1 + $0x80] ss:$16 sps:$4 sm:$0xff]  }
   0x5   :  { %v3346_v13 = vld [vmem:[%s3995_s1 + $0x64] ss:$16 sps:$4 sm:$0xff]   ;;  %v3351_v14 = vld [vmem:[%s3995_s1 + $0xac] ss:$16 sps:$4 sm:$0xff]   ;;  %v3358_v15 = vld [vmem:[%s3995_s1 + $0xa8] ss:$16 sps:$4 sm:$0xff]  }
   0x6   :  { %v3364_v16 = vld [vmem:[%s3995_s1 + $0x8c] ss:$16 sps:$4 sm:$0xff]   ;;  %v3370_v17 = vld [vmem:[%s3995_s1 + $0x60] ss:$16 sps:$4 sm:$0xff]   ;;  %v3376_v18 = vld [vmem:[%s3995_s1 + $0x44] ss:$16 sps:$4 sm:$0xff]  }
   0x7   :  { %224 = vmatpush1.bf16.msra.mxu0 %v3294_v4  ;;  %265 = vmatpush1.bf16.msra.mxu1 %v3334_v11  ;;  %v3382_v19 = vld [vmem:[%s3995_s1 + $0x88] ss:$16 sps:$4 sm:$0xff]   ;;  %v3388_v20 = vld [vmem:[%s3995_s1 + $0x6c] ss:$16 sps:$4 sm:$0xff]   ;;  %v3394_v21 = vld [vmem:[%s3995_s1 + $0x40] ss:$16 sps:$4 sm:$0xff]  }
   0x8   :  { %225 = vmatprep.subr.bf16.mxu0 %v3300_v5  ;;  %266 = vmatprep.subr.bf16.mxu1 %v3351_v14  ;;  %v3399_v22 = vld [vmem:[%s3995_s1 + $0x24] ss:$16 sps:$4 sm:$0xff]   ;;  %v3406_v23 = vld [vmem:[%s3995_s1 + $0x68] ss:$16 sps:$4 sm:$0xff]   ;;  %v3411_v24 = vld [vmem:[%s3995_s1 + $0x20] ss:$16 sps:$4 sm:$0xff]  }
   0x9   :  { %v3417_v25 = vld [vmem:[%s3995_s1 + $0x4c] ss:$16 sps:$4 sm:$0xff]   ;;  %v3422_v26 = vld [vmem:[%s3995_s1 + $0x4] ss:$16 sps:$4 sm:$0xff]   ;;  %v3427_v27 = vld [vmem:[%s3995_s1 + $0x48] ss:$16 sps:$4 sm:$0xff]  }
   0xa   :  { %v3433_v28 = vld [vmem:[%s3995_s1 + $0x2c] ss:$16 sps:$4 sm:$0xff]   ;;  %v3440_v29 = vld [vmem:[%s3995_s1] ss:$16 sps:$4 sm:$0xff]   ;;  %v3446_v30 = vld [vmem:[%s3995_s1 + $0x28] ss:$16 sps:$4 sm:$0xff]  }
   0xb   :  { %226 = vmatpush1.bf16.msra.mxu0 %v3316_v8  ;;  %267 = vmatpush1.bf16.msra.mxu1 %v3358_v15  ;;  %v3452_v31 = vld [vmem:[%s3995_s1 + $0xc] ss:$16 sps:$4 sm:$0xff]   ;;  %v3462_v32 = vld [vmem:[%s3995_s1 + $0x8] ss:$16 sps:$4 sm:$0xff]   ;;  %v21_v34 = vld [vmem:[%s3996_s0] sm:$0xff] }
   0xc   :  { %227 = vmatprep.subr.bf16.mxu0 %v3323_v9  ;;  %268 = vmatprep.subr.bf16.mxu1 %v3364_v16  ;;  %v23_v35 = vunpack.c.l.bf16 %v21_v34  ;;  %v24_v36 = vunpack.c.h.bf16 %v21_v34  ;;  %v22_v44 = vld [vmem:[%s3996_s0 + $0x8] sm:$0xff] }
   0xd   :  { %v26_v48 = vunpack.c.h.bf16 %v22_v44  ;;  %v25_v50 = vunpack.c.l.bf16 %v22_v44 }
   0xf   :  { %228 = vmatpush1.bf16.msra.mxu0 %v3341_v12  ;;  %269 = vmatpush1.bf16.msra.mxu1 %v3382_v19 }
  0x10   :  { %229 = vmatprep.subr.bf16.mxu0 %v3346_v13  ;;  %270 = vmatprep.subr.bf16.mxu1 %v3388_v20 }
  0x13   :  { %230 = vmatpush1.bf16.msra.mxu0 %v3370_v17  ;;  %271 = vmatpush1.bf16.msra.mxu1 %v3406_v23 }
  0x14   :  { %231 = vmatprep.subr.bf16.mxu0 %v3376_v18  ;;  %272 = vmatprep.subr.bf16.mxu1 %v3417_v25 }
  0x17   :  { %232 = vmatpush1.bf16.msra.mxu0 %v3394_v21  ;;  %273 = vmatpush1.bf16.msra.mxu1 %v3427_v27 }
  0x18   :  { %233 = vmatprep.subr.bf16.mxu0 %v3399_v22  ;;  %274 = vmatprep.subr.bf16.mxu1 %v3433_v28 }
  0x1b   :  { %234 = vmatpush1.bf16.msra.mxu0 %v3411_v24  ;;  %275 = vmatpush1.bf16.msra.mxu1 %v3446_v30 }
  0x1c   :  { %235 = vmatprep.subr.bf16.mxu0 %v3422_v26  ;;  %276 = vmatprep.subr.bf16.mxu1 %v3452_v31 }
  0x1f   :  { %236 = vmatpush1.bf16.msra.mxu0 %v3440_v29  ;;  %277 = vmatpush1.bf16.msra.mxu1 %v3462_v32 }
  0x20   :  { %538 = vmatprep.subr.bf16.mxu0 %v3275_v0  ;;  %579 = vmatprep.subr.bf16.mxu1 %v3305_v6 }
  0x22   :  { %254 = vmatmul.mubr.bf16.vlgmr.msra.gmra.mxu0 %v3244_v33  ;;  %295 = vmatmul.mubr.bf16.vlgmr.msra.gmra.mxu1 %v3244_v33 }
  0x23   :  { %539 = vmatpush1.bf16.msra.mxu0 %v3282_v2  ;;  %570 = vmatprep.mubr.bf16.mxu0 %v3243_v1 }
  0x24   :  { %540 = vmatprep.subr.bf16.mxu0 %v3288_v3  ;;  %580 = vmatpush1.bf16.msra.mxu1 %v3310_v7 }
  0x25   :  { %581 = vmatprep.subr.bf16.mxu1 %v3329_v10  ;;  %611 = vmatprep.mubr.bf16.mxu1 %v3243_v1 }
  0x27   :  { %541 = vmatpush1.bf16.msra.mxu0 %v3294_v4 }
  0x28   :  { %542 = vmatprep.subr.bf16.mxu0 %v3300_v5  ;;  %582 = vmatpush1.bf16.msra.mxu1 %v3334_v11 }
  0x29   :  { %583 = vmatprep.subr.bf16.mxu1 %v3351_v14 }
  0x2b   :  { %543 = vmatpush1.bf16.msra.mxu0 %v3316_v8 }
  0x2c   :  { %544 = vmatprep.subr.bf16.mxu0 %v3323_v9  ;;  %584 = vmatpush1.bf16.msra.mxu1 %v3358_v15 }
  0x2d   :  { %585 = vmatprep.subr.bf16.mxu1 %v3364_v16 }
  0x2f   :  { %545 = vmatpush1.bf16.msra.mxu0 %v3341_v12 }
  0x30   :  { %546 = vmatprep.subr.bf16.mxu0 %v3346_v13  ;;  %586 = vmatpush1.bf16.msra.mxu1 %v3382_v19 }
  0x31   :  { %587 = vmatprep.subr.bf16.mxu1 %v3388_v20 }
  0x33   :  { %547 = vmatpush1.bf16.msra.mxu0 %v3370_v17 }
  0x34   :  { %548 = vmatprep.subr.bf16.mxu0 %v3376_v18  ;;  %588 = vmatpush1.bf16.msra.mxu1 %v3406_v23 }
  0x35   :  { %589 = vmatprep.subr.bf16.mxu1 %v3417_v25 }
  0x37   :  { %549 = vmatpush1.bf16.msra.mxu0 %v3394_v21 }
  0x38   :  { %550 = vmatprep.subr.bf16.mxu0 %v3399_v22  ;;  %590 = vmatpush1.bf16.msra.mxu1 %v3427_v27 }
  0x39   :  { %591 = vmatprep.subr.bf16.mxu1 %v3433_v28 }
  0x3b   :  { %551 = vmatpush1.bf16.msra.mxu0 %v3411_v24 }
  0x3c   :  { %552 = vmatprep.subr.bf16.mxu0 %v3422_v26  ;;  %592 = vmatpush1.bf16.msra.mxu1 %v3446_v30 }
  0x3d   :  { %593 = vmatprep.subr.bf16.mxu1 %v3452_v31 }
  0x3f   :  { %553 = vmatpush1.bf16.msra.mxu0 %v3440_v29 }
  0x40   :  { %855 = vmatprep.subr.bf16.mxu0 %v3275_v0  ;;  %594 = vmatpush1.bf16.msra.mxu1 %v3462_v32 }
  0x41   :  { %896 = vmatprep.subr.bf16.mxu1 %v3305_v6 }
  0xe2   :  { %v255_v37 = vpop.f32.mrf.mxu0  ;;  %v296_v45 = vpop.f32.mrf.mxu1 }
  0xe3   :  { %v303_v38 = vadd.f32 %v255_v37, %v23_v35  ;;  %v305_v53 = vadd.f32 %v296_v45, %v25_v50 }
  0xe4   :  { %v257_v39 = vpop.f32.mrf.mxu0  ;;  %v298_v47 = vpop.f32.mrf.mxu1 }
  0xe5   :  { %v2707_v40 = vmul.f32 -1.442695, %v303_v38  ;;  %v304_v41 = vadd.f32 %v257_v39, %v24_v36  ;;  %v306_v52 = vadd.f32 %v298_v47, %v26_v48 }
  0xe6   :  { %v259_v42 = vpop.f32.mrf.mxu0  ;;  %v300_v49 = vpop.f32.mrf.mxu1 }
  0xe7   :  { %3115 = vpow2.f32 %v2707_v40  ;;  %v2708_v43 = vmul.f32 -1.442695, %v304_v41  ;;  %v2709_v54 = vmul.f32 -1.442695, %v306_v52  ;;  %v2710_v40 = vld [vmem:[%s3996_s0 + $0x10] sm:$0xff] }
  0xe8   :  { %v260_v46 = vpop.f32.mrf.mxu0  ;;  %v301_v51 = vpop.f32.mrf.mxu1  ;;  %v340_v41 = vunpack.c.l.bf16 %v2710_v40  ;;  %v341_v42 = vunpack.c.h.bf16 %v2710_v40 }
  0xe9   :  { %3117 = vpow2.f32 %v2708_v43 }
  0xea   :  { %3119 = vtanh.f32 %v305_v53 }
  0xeb   :  { %3121 = vpow2.f32 %v2709_v54 }
  0xf4   :  { %v3116_v55 = vpop.eup %3115 }
  0xf5   :  { %v310_v56 = vadd.f32 1.0, %v3116_v55 }
  0xf6   :  { %v3118_v57 = vpop.eup %3117 }
  0xf7   :  { %3123 = vrcp.f32 %v310_v56  ;;  %v316_v58 = vadd.f32 1.0, %v3118_v57  ;;  %v3120_v59 = vpop.eup %3119 }
  0xf8   :  { %v3122_v60 = vpop.eup %3121 }
  0xf9   :  { %3125 = vrcp.f32 %v316_v58  ;;  %v323_v63 = vadd.f32 1.0, %v3122_v60 }
  0xfb   :  { %3127 = vrcp.f32 %v323_v63 }
 0x104   :  { %v3124_v61 = vpop.eup %3123 }
 0x105   :  { %v328_v34 = vmul.f32 %v3124_v61, %v3120_v59 }
 0x106   :  { %v3126_v62 = vpop.eup %3125 }
 0x107   :  { %v327_v33 = vmul.f32 0.0, %v3126_v62 }
 0x108   :  { %v3128_v36 = vpop.eup %3127 }
 0x109   :  { %v3508_v35 = vadd.f32 %v328_v34, %v327_v33 }
 0x10b   :  { %3129 = vtanh.f32 %v3508_v35 }
 0x118   :  { %v3130_v37 = vpop.eup %3129 }
 0x119   :  { %v3511_v38 = vmul.f32 %v3130_v37, %v3128_v36 }
 0x11b   :  { %v345_v39 = vpack.c.bf16 %v3511_v38, %v3511_v38 }
 0x11d   :  { %571 = vmatmul.mubr.bf16.vlgmr.msra.gmra.mxu0 %v345_v39  ;;  %612 = vmatmul.mubr.bf16.vlgmr.msra.gmra.mxu1 %v345_v39 }
 0x11e   :  { %856 = vmatpush1.bf16.msra.mxu0 %v3282_v2  ;;  %897 = vmatpush1.bf16.msra.mxu1 %v3310_v7 }
 0x11f   :  { %857 = vmatprep.subr.bf16.mxu0 %v3288_v3  ;;  %898 = vmatprep.subr.bf16.mxu1 %v3329_v10 }
 0x120   :  { %887 = vmatprep.mubr.bf16.mxu0 %v3243_v1  ;;  %928 = vmatprep.mubr.bf16.mxu1 %v3243_v1 }
 0x122   :  { %858 = vmatpush1.bf16.msra.mxu0 %v3294_v4  ;;  %899 = vmatpush1.bf16.msra.mxu1 %v3334_v11 }
 0x123   :  { %859 = vmatprep.subr.bf16.mxu0 %v3300_v5  ;;  %900 = vmatprep.subr.bf16.mxu1 %v3351_v14 }
 0x126   :  { %860 = vmatpush1.bf16.msra.mxu0 %v3316_v8  ;;  %901 = vmatpush1.bf16.msra.mxu1 %v3358_v15 }
 0x127   :  { %861 = vmatprep.subr.bf16.mxu0 %v3323_v9  ;;  %902 = vmatprep.subr.bf16.mxu1 %v3364_v16 }
 0x12a   :  { %862 = vmatpush1.bf16.msra.mxu0 %v3341_v12  ;;  %903 = vmatpush1.bf16.msra.mxu1 %v3382_v19 }
 0x12b   :  { %863 = vmatprep.subr.bf16.mxu0 %v3346_v13  ;;  %904 = vmatprep.subr.bf16.mxu1 %v3388_v20 }
 0x12e   :  { %864 = vmatpush1.bf16.msra.mxu0 %v3370_v17  ;;  %905 = vmatpush1.bf16.msra.mxu1 %v3406_v23 }
 0x12f   :  { %865 = vmatprep.subr.bf16.mxu0 %v3376_v18  ;;  %906 = vmatprep.subr.bf16.mxu1 %v3417_v25 }
 0x132   :  { %866 = vmatpush1.bf16.msra.mxu0 %v3394_v21  ;;  %907 = vmatpush1.bf16.msra.mxu1 %v3427_v27 }
 0x133   :  { %867 = vmatprep.subr.bf16.mxu0 %v3399_v22  ;;  %908 = vmatprep.subr.bf16.mxu1 %v3433_v28 }
 0x136   :  { %868 = vmatpush1.bf16.msra.mxu0 %v3411_v24  ;;  %909 = vmatpush1.bf16.msra.mxu1 %v3446_v30 }
 0x137   :  { %869 = vmatprep.subr.bf16.mxu0 %v3422_v26  ;;  %910 = vmatprep.subr.bf16.mxu1 %v3452_v31 }
 0x13a   :  { %870 = vmatpush1.bf16.msra.mxu0 %v3440_v29  ;;  %911 = vmatpush1.bf16.msra.mxu1 %v3462_v32 }
 0x13b   :  { %1172 = vmatprep.subr.bf16.mxu0 %v3275_v0  ;;  %1213 = vmatprep.subr.bf16.mxu1 %v3305_v6  ;;  %v2711_v6 = vld [vmem:[%s3996_s0 + $0x18] sm:$0xff] }
 0x13c   :  { %v343_v54 = vunpack.c.h.bf16 %v2711_v6  ;;  %v342_v56 = vunpack.c.l.bf16 %v2711_v6  ;;  %v3619_v6 = vld [vmem:[%s3995_s1 + $0xec] ss:$16 sps:$4 sm:$0xff]  }
 0x1dd   :  { %v572_v43 = vpop.f32.mrf.mxu0  ;;  %v613_v44 = vpop.f32.mrf.mxu1 }
 0x1de   :  { %v620_v45 = vadd.f32 %v572_v43, %v340_v41  ;;  %v622_v59 = vadd.f32 %v613_v44, %v342_v56  ;;  %v3643_v56 = vld [vmem:[%s3995_s1 + $0xcc] ss:$16 sps:$4 sm:$0xff]  }
 0x1df   :  { %v574_v46 = vpop.f32.mrf.mxu0  ;;  %v615_v47 = vpop.f32.mrf.mxu1 }
 0x1e0   :  { %v2744_v48 = vmul.f32 -1.442695, %v620_v45  ;;  %v621_v49 = vadd.f32 %v574_v46, %v341_v42  ;;  %v623_v55 = vadd.f32 %v615_v47, %v343_v54  ;;  %v3629_v54 = vld [vmem:[%s3995_s1 + $0xe8] ss:$16 sps:$4 sm:$0xff]  }
 0x1e1   :  { %v576_v50 = vpop.f32.mrf.mxu0  ;;  %v617_v51 = vpop.f32.mrf.mxu1 }
 0x1e2   :  { %3131 = vpow2.f32 %v2744_v48  ;;  %v2745_v52 = vmul.f32 -1.442695, %v621_v49  ;;  %v2746_v57 = vmul.f32 -1.442695, %v623_v55  ;;  %v3638_v55 = vld [vmem:[%s3995_s1 + $0xc4] ss:$16 sps:$4 sm:$0xff]  }
 0x1e3   :  { %v577_v0 = vpop.f32.mrf.mxu0  ;;  %v618_v53 = vpop.f32.mrf.mxu1 }
 0x1e4   :  { %3133 = vpow2.f32 %v2745_v52  ;;  %v3614_v53 = vld [vmem:[%s3995_s1 + $0xe4] ss:$16 sps:$4 sm:$0xff]  }
 0x1e5   :  { %3135 = vpow2.f32 %v2746_v57  ;;  %v3648_v57 = vld [vmem:[%s3995_s1 + $0xc0] ss:$16 sps:$4 sm:$0xff]  }
 0x1ef   :  { %v3132_v58 = vpop.eup %3131 }
 0x1f0   :  { %v627_v60 = vadd.f32 1.0, %v3132_v58  ;;  %v3653_v58 = vld [vmem:[%s3995_s1 + $0xc8] ss:$16 sps:$4 sm:$0xff]  }
 0x1f1   :  { %v3134_v61 = vpop.eup %3133 }
 0x1f2   :  { %3137 = vrcp.f32 %v627_v60  ;;  %v633_v62 = vadd.f32 1.0, %v3134_v61  ;;  %v3136_v63 = vpop.eup %3135  ;;  %v3667_v60 = vld [vmem:[%s3995_s1 + $0xac] ss:$16 sps:$4 sm:$0xff]   ;;  %v3672_v61 = vld [vmem:[%s3995_s1 + $0xa0] ss:$16 sps:$4 sm:$0xff]  }
 0x1f3   :  { %3139 = vtanh.f32 %v622_v59  ;;  %v640_v37 = vadd.f32 1.0, %v3136_v63  ;;  %v3662_v59 = vld [vmem:[%s3995_s1 + $0xa4] ss:$16 sps:$4 sm:$0xff]  }
 0x1f4   :  { %3141 = vrcp.f32 %v633_v62  ;;  %v3677_v62 = vld [vmem:[%s3995_s1 + $0xa8] ss:$16 sps:$4 sm:$0xff]   ;;  %v3686_v63 = vld [vmem:[%s3995_s1 + $0x84] ss:$16 sps:$4 sm:$0xff]  }
 0x1f5   :  { %3143 = vrcp.f32 %v640_v37  ;;  %v3708_v37 = vld [vmem:[%s3995_s1 + $0x64] ss:$16 sps:$4 sm:$0xff]  }
 0x1ff   :  { %v3138_v33 = vpop.eup %3137 }
 0x200   :  { %v3140_v34 = vpop.eup %3139 }
 0x201   :  { %v3142_v36 = vpop.eup %3141  ;;  %v645_v39 = vmul.f32 %v3140_v34, %v3138_v33  ;;  %v3691_v33 = vld [vmem:[%s3995_s1 + $0x8c] ss:$16 sps:$4 sm:$0xff]   ;;  %v3696_v34 = vld [vmem:[%s3995_s1 + $0x80] ss:$16 sps:$4 sm:$0xff]  }
 0x202   :  { %v644_v40 = vmul.f32 %v3142_v36, %v3508_v35  ;;  %v3144_v42 = vpop.eup %3143  ;;  %v3701_v36 = vld [vmem:[%s3995_s1 + $0x88] ss:$16 sps:$4 sm:$0xff]  }
 0x204   :  { %v3556_v41 = vadd.f32 %v645_v39, %v644_v40  ;;  %v3713_v39 = vld [vmem:[%s3995_s1 + $0x6c] ss:$16 sps:$4 sm:$0xff]   ;;  %v3720_v40 = vld [vmem:[%s3995_s1 + $0x60] ss:$16 sps:$4 sm:$0xff]  }
 0x206   :  { %3145 = vtanh.f32 %v3556_v41 }
 0x213   :  { %v3146_v43 = vpop.eup %3145 }
 0x214   :  { %v3559_v44 = vmul.f32 %v3146_v43, %v3144_v42  ;;  %v3732_v42 = vld [vmem:[%s3995_s1 + $0x44] ss:$16 sps:$4 sm:$0xff]   ;;  %v3737_v43 = vld [vmem:[%s3995_s1 + $0x4c] ss:$16 sps:$4 sm:$0xff]  }
 0x216   :  { %v662_v45 = vpack.c.bf16 %v3559_v44, %v3559_v44  ;;  %v652_v50 = vadd.f32 %v3559_v44, %v3511_v38  ;;  %v3624_v38 = vld [vmem:[%s3995_s1 + $0xe0] ss:$16 sps:$4 sm:$0xff]  }
 0x217   :  { %v3744_v44 = vld [vmem:[%s3995_s1 + $0x40] ss:$16 sps:$4 sm:$0xff]  }
 0x218   :  { %888 = vmatmul.mubr.bf16.vlgmr.msra.gmra.mxu0 %v662_v45  ;;  %929 = vmatmul.mubr.bf16.vlgmr.msra.gmra.mxu1 %v662_v45  ;;  %v3749_v45 = vld [vmem:[%s3995_s1 + $0x48] ss:$16 sps:$4 sm:$0xff]  }
 0x219   :  { %1173 = vmatpush1.bf16.msra.mxu0 %v3282_v2  ;;  %1214 = vmatpush1.bf16.msra.mxu1 %v3310_v7  ;;  %v2747_v2 = vld [vmem:[%s3996_s0 + $0x20] sm:$0xff] }
 0x21a   :  { %1174 = vmatprep.subr.bf16.mxu0 %v3288_v3  ;;  %1215 = vmatprep.subr.bf16.mxu1 %v3329_v10  ;;  %v657_v3 = vunpack.c.l.bf16 %v2747_v2 }
 0x21b   :  { %1204 = vmatprep.mubr.bf16.mxu0 %v3243_v1  ;;  %1245 = vmatprep.mubr.bf16.mxu1 %v3243_v1 }
 0x21d   :  { %1175 = vmatpush1.bf16.msra.mxu0 %v3294_v4  ;;  %1216 = vmatpush1.bf16.msra.mxu1 %v3334_v11  ;;  %v658_v4 = vunpack.c.h.bf16 %v2747_v2  ;;  %v3756_v2 = vld [vmem:[%s3995_s1 + $0x24] ss:$16 sps:$4 sm:$0xff]  }
 0x21e   :  { %1176 = vmatprep.subr.bf16.mxu0 %v3300_v5  ;;  %1217 = vmatprep.subr.bf16.mxu1 %v3351_v14 }
 0x221   :  { %1177 = vmatpush1.bf16.msra.mxu0 %v3316_v8  ;;  %1218 = vmatpush1.bf16.msra.mxu1 %v3358_v15 }
 0x222   :  { %1178 = vmatprep.subr.bf16.mxu0 %v3323_v9  ;;  %1219 = vmatprep.subr.bf16.mxu1 %v3364_v16 }
 0x225   :  { %1179 = vmatpush1.bf16.msra.mxu0 %v3341_v12  ;;  %1220 = vmatpush1.bf16.msra.mxu1 %v3382_v19 }
 0x226   :  { %1180 = vmatprep.subr.bf16.mxu0 %v3346_v13  ;;  %1221 = vmatprep.subr.bf16.mxu1 %v3388_v20 }
 0x229   :  { %1181 = vmatpush1.bf16.msra.mxu0 %v3370_v17  ;;  %1222 = vmatpush1.bf16.msra.mxu1 %v3406_v23 }
 0x22a   :  { %1182 = vmatprep.subr.bf16.mxu0 %v3376_v18  ;;  %1223 = vmatprep.subr.bf16.mxu1 %v3417_v25  ;;  %v2748_v18 = vld [vmem:[%s3996_s0 + $0x28] sm:$0xff] }
 0x22b   :  { %v660_v19 = vunpack.c.h.bf16 %v2748_v18 }
 0x22d   :  { %1183 = vmatpush1.bf16.msra.mxu0 %v3394_v21  ;;  %1224 = vmatpush1.bf16.msra.mxu1 %v3427_v27  ;;  %v659_v21 = vunpack.c.l.bf16 %v2748_v18 }
 0x22e   :  { %1184 = vmatprep.subr.bf16.mxu0 %v3399_v22  ;;  %1225 = vmatprep.subr.bf16.mxu1 %v3433_v28 }
 0x231   :  { %1185 = vmatpush1.bf16.msra.mxu0 %v3411_v24  ;;  %1226 = vmatpush1.bf16.msra.mxu1 %v3446_v30 }
 0x232   :  { %1186 = vmatprep.subr.bf16.mxu0 %v3422_v26  ;;  %1227 = vmatprep.subr.bf16.mxu1 %v3452_v31 }
 0x235   :  { %1187 = vmatpush1.bf16.msra.mxu0 %v3440_v29  ;;  %1228 = vmatpush1.bf16.msra.mxu1 %v3462_v32 }
 0x236   :  { %1489 = vmatprep.subr.bf16.mxu0 %v3614_v53  ;;  %1530 = vmatprep.subr.bf16.mxu1 %v3619_v6 }
 0x2d8   :  { %v889_v5 = vpop.f32.mrf.mxu0  ;;  %v930_v7 = vpop.f32.mrf.mxu1 }
 0x2d9   :  { %v937_v8 = vadd.f32 %v889_v5, %v657_v3  ;;  %v939_v24 = vadd.f32 %v930_v7, %v659_v21  ;;  %v3761_v3 = vld [vmem:[%s3995_s1 + $0x2c] ss:$16 sps:$4 sm:$0xff]   ;;  %v3773_v5 = vld [vmem:[%s3995_s1 + $0x28] ss:$16 sps:$4 sm:$0xff]   ;;  %v3780_v7 = vld [vmem:[%s3995_s1 + $0x4] ss:$16 sps:$4 sm:$0xff]  }
 0x2da   :  { %v891_v9 = vpop.f32.mrf.mxu0  ;;  %v932_v10 = vpop.f32.mrf.mxu1 }
 0x2db   :  { %v2781_v11 = vmul.f32 -1.442695, %v937_v8  ;;  %v938_v12 = vadd.f32 %v891_v9, %v658_v4  ;;  %v940_v20 = vadd.f32 %v932_v10, %v660_v19  ;;  %v3768_v4 = vld [vmem:[%s3995_s1 + $0x20] ss:$16 sps:$4 sm:$0xff]   ;;  %v3785_v8 = vld [vmem:[%s3995_s1 + $0xc] ss:$16 sps:$4 sm:$0xff]  }
 0x2dc   :  { %v893_v13 = vpop.f32.mrf.mxu0  ;;  %v934_v14 = vpop.f32.mrf.mxu1  ;;  %v3792_v9 = vld [vmem:[%s3995_s1] ss:$16 sps:$4 sm:$0xff]   ;;  %v3797_v10 = vld [vmem:[%s3995_s1 + $0x8] ss:$16 sps:$4 sm:$0xff]  }
 0x2dd   :  { %3147 = vpow2.f32 %v2781_v11  ;;  %v2782_v15 = vmul.f32 -1.442695, %v938_v12  ;;  %v2783_v22 = vmul.f32 -1.442695, %v940_v20  ;;  %v2784_v11 = vld [vmem:[%s3996_s0 + $0x30] sm:$0xff] }
 0x2de   :  { %v894_v16 = vpop.f32.mrf.mxu0  ;;  %v935_v17 = vpop.f32.mrf.mxu1  ;;  %v974_v12 = vunpack.c.l.bf16 %v2784_v11  ;;  %v975_v13 = vunpack.c.h.bf16 %v2784_v11 }
 0x2df   :  { %3149 = vpow2.f32 %v2782_v15 }
 0x2e0   :  { %3151 = vpow2.f32 %v2783_v22 }
 0x2ea   :  { %v3148_v23 = vpop.eup %3147 }
 0x2eb   :  { %v944_v25 = vadd.f32 1.0, %v3148_v23 }
 0x2ec   :  { %v3150_v26 = vpop.eup %3149 }
 0x2ed   :  { %3153 = vrcp.f32 %v944_v25  ;;  %v950_v27 = vadd.f32 1.0, %v3150_v26  ;;  %v3152_v28 = vpop.eup %3151  ;;  %v2785_v26 = vld [vmem:[%s3996_s0 + $0x38] sm:$0xff] }
 0x2ee   :  { %3155 = vtanh.f32 %v939_v24  ;;  %v957_v32 = vadd.f32 1.0, %v3152_v28 }
 0x2ef   :  { %3157 = vrcp.f32 %v950_v27  ;;  %v977_v27 = vunpack.c.h.bf16 %v2785_v26 }
 0x2f0   :  { %3159 = vrcp.f32 %v957_v32 }
 0x2fa   :  { %v3154_v29 = vpop.eup %3153 }
 0x2fb   :  { %v3156_v30 = vpop.eup %3155 }
 0x2fc   :  { %v3158_v31 = vpop.eup %3157  ;;  %v962_v35 = vmul.f32 %v3156_v30, %v3154_v29  ;;  %v976_v29 = vunpack.c.l.bf16 %v2785_v26 }
 0x2fd   :  { %v961_v46 = vmul.f32 %v3158_v31, %v3556_v41  ;;  %v3160_v48 = vpop.eup %3159  ;;  %v3725_v41 = vld [vmem:[%s3995_s1 + $0x68] ss:$16 sps:$4 sm:$0xff]  }
 0x2ff   :  { %v3602_v47 = vadd.f32 %v962_v35, %v961_v46 }
 0x301   :  { %3161 = vtanh.f32 %v3602_v47 }
 0x30e   :  { %v3162_v49 = vpop.eup %3161 }
 0x30f   :  { %v965_v51 = vmul.f32 %v3162_v49, %v3160_v48 }
 0x311   :  { %v3607_v52 = vadd.f32 %v965_v51, %v652_v50  ;;  %v979_v0 = vpack.c.bf16 %v965_v51, %v965_v51 }
 0x313   :  { %1205 = vmatmul.mubr.bf16.vlgmr.msra.gmra.mxu0 %v979_v0  ;;  %1246 = vmatmul.mubr.bf16.vlgmr.msra.gmra.mxu1 %v979_v0 }
 0x314   :  { %1521 = vmatprep.mubr.bf16.mxu0 %v3243_v1  ;;  %1562 = vmatprep.mubr.bf16.mxu1 %v3243_v1 }
 0x315   :  { %1490 = vmatpush1.bf16.msra.mxu0 %v3624_v38  ;;  %1531 = vmatpush1.bf16.msra.mxu1 %v3629_v54 }
 0x316   :  { %1491 = vmatprep.subr.bf16.mxu0 %v3638_v55  ;;  %1532 = vmatprep.subr.bf16.mxu1 %v3643_v56 }
 0x319   :  { %1492 = vmatpush1.bf16.msra.mxu0 %v3648_v57  ;;  %1533 = vmatpush1.bf16.msra.mxu1 %v3653_v58 }
 0x31a   :  { %1493 = vmatprep.subr.bf16.mxu0 %v3662_v59  ;;  %1534 = vmatprep.subr.bf16.mxu1 %v3667_v60 }
 0x31d   :  { %1494 = vmatpush1.bf16.msra.mxu0 %v3672_v61  ;;  %1535 = vmatpush1.bf16.msra.mxu1 %v3677_v62 }
 0x31e   :  { %1495 = vmatprep.subr.bf16.mxu0 %v3686_v63  ;;  %1536 = vmatprep.subr.bf16.mxu1 %v3691_v33 }
 0x321   :  { %1496 = vmatpush1.bf16.msra.mxu0 %v3696_v34  ;;  %1537 = vmatpush1.bf16.msra.mxu1 %v3701_v36 }
 0x322   :  { %1497 = vmatprep.subr.bf16.mxu0 %v3708_v37  ;;  %1538 = vmatprep.subr.bf16.mxu1 %v3713_v39 }
 0x325   :  { %1498 = vmatpush1.bf16.msra.mxu0 %v3720_v40  ;;  %1539 = vmatpush1.bf16.msra.mxu1 %v3725_v41 }
 0x326   :  { %1499 = vmatprep.subr.bf16.mxu0 %v3732_v42  ;;  %1540 = vmatprep.subr.bf16.mxu1 %v3737_v43 }
 0x329   :  { %1500 = vmatpush1.bf16.msra.mxu0 %v3744_v44  ;;  %1541 = vmatpush1.bf16.msra.mxu1 %v3749_v45 }
 0x32a   :  { %1501 = vmatprep.subr.bf16.mxu0 %v3756_v2  ;;  %1542 = vmatprep.subr.bf16.mxu1 %v3761_v3 }
 0x32d   :  { %1502 = vmatpush1.bf16.msra.mxu0 %v3768_v4  ;;  %1543 = vmatpush1.bf16.msra.mxu1 %v3773_v5 }
 0x32e   :  { %1503 = vmatprep.subr.bf16.mxu0 %v3780_v7  ;;  %1544 = vmatprep.subr.bf16.mxu1 %v3785_v8 }
 0x331   :  { %1504 = vmatpush1.bf16.msra.mxu0 %v3792_v9  ;;  %1545 = vmatpush1.bf16.msra.mxu1 %v3797_v10 }
 0x332   :  { %1806 = vmatprep.subr.bf16.mxu0 %v3614_v53  ;;  %1847 = vmatprep.subr.bf16.mxu1 %v3619_v6 }
 0x3d3   :  { %v1206_v14 = vpop.f32.mrf.mxu0  ;;  %v1247_v15 = vpop.f32.mrf.mxu1 }
 0x3d4   :  { %v1254_v16 = vadd.f32 %v1206_v14, %v974_v12  ;;  %v1256_v32 = vadd.f32 %v1247_v15, %v976_v29 }
 0x3d5   :  { %v1208_v17 = vpop.f32.mrf.mxu0  ;;  %v1249_v18 = vpop.f32.mrf.mxu1 }
 0x3d6   :  { %v2818_v19 = vmul.f32 -1.442695, %v1254_v16  ;;  %v1255_v20 = vadd.f32 %v1208_v17, %v975_v13  ;;  %v1257_v28 = vadd.f32 %v1249_v18, %v977_v27 }
 0x3d7   :  { %v1210_v21 = vpop.f32.mrf.mxu0  ;;  %v1251_v22 = vpop.f32.mrf.mxu1 }
 0x3d8   :  { %3163 = vpow2.f32 %v2818_v19  ;;  %v2819_v23 = vmul.f32 -1.442695, %v1255_v20  ;;  %v2820_v30 = vmul.f32 -1.442695, %v1257_v28 }
 0x3d9   :  { %v1211_v24 = vpop.f32.mrf.mxu0  ;;  %v1252_v25 = vpop.f32.mrf.mxu1 }
 0x3da   :  { %3165 = vpow2.f32 %v2819_v23 }
 0x3db   :  { %3167 = vpow2.f32 %v2820_v30 }
 0x3e5   :  { %v3164_v31 = vpop.eup %3163 }
 0x3e6   :  { %v1261_v35 = vadd.f32 1.0, %v3164_v31 }
 0x3e7   :  { %v3166_v46 = vpop.eup %3165 }
 0x3e8   :  { %3169 = vrcp.f32 %v1261_v35  ;;  %v1267_v48 = vadd.f32 1.0, %v3166_v46  ;;  %v3168_v49 = vpop.eup %3167  ;;  %v2822_v35 = vld [vmem:[%s3996_s0 + $0x48] sm:$0xff] }
 0x3e9   :  { %3171 = vtanh.f32 %v1256_v32  ;;  %v1274_v11 = vadd.f32 1.0, %v3168_v49  ;;  %v1294_v46 = vunpack.c.h.bf16 %v2822_v35  ;;  %v1293_v49 = vunpack.c.l.bf16 %v2822_v35 }
 0x3ea   :  { %3173 = vrcp.f32 %v1267_v48 }
 0x3eb   :  { %3175 = vrcp.f32 %v1274_v11 }
 0x3f5   :  { %v3170_v50 = vpop.eup %3169 }
 0x3f6   :  { %v3172_v51 = vpop.eup %3171 }
 0x3f7   :  { %v3174_v0 = vpop.eup %3173  ;;  %v1279_v12 = vmul.f32 %v3172_v51, %v3170_v50 }
 0x3f8   :  { %v1278_v13 = vmul.f32 %v3174_v0, %v3602_v47  ;;  %v3176_v15 = vpop.eup %3175  ;;  %v2821_v47 = vld [vmem:[%s3996_s0 + $0x40] sm:$0xff] }
 0x3f9   :  { %v1292_v20 = vunpack.c.h.bf16 %v2821_v47 }
 0x3fa   :  { %v3812_v14 = vadd.f32 %v1279_v12, %v1278_v13 }
 0x3fc   :  { %3177 = vtanh.f32 %v3812_v14 }
 0x409   :  { %v3178_v16 = vpop.eup %3177 }
 0x40a   :  { %v1282_v17 = vmul.f32 %v3178_v16, %v3176_v15 }
 0x40c   :  { %v3816_v18 = vadd.f32 %v1282_v17, %v3607_v52  ;;  %v1296_v19 = vpack.c.bf16 %v1282_v17, %v1282_v17  ;;  %v1291_v52 = vunpack.c.l.bf16 %v2821_v47 }
 0x40e   :  { %1522 = vmatmul.mubr.bf16.vlgmr.msra.gmra.mxu0 %v1296_v19  ;;  %1563 = vmatmul.mubr.bf16.vlgmr.msra.gmra.mxu1 %v1296_v19 }
 0x40f   :  { %1807 = vmatpush1.bf16.msra.mxu0 %v3624_v38  ;;  %1848 = vmatpush1.bf16.msra.mxu1 %v3629_v54 }
 0x410   :  { %1808 = vmatprep.subr.bf16.mxu0 %v3638_v55  ;;  %1849 = vmatprep.subr.bf16.mxu1 %v3643_v56 }
 0x411   :  { %1838 = vmatprep.mubr.bf16.mxu0 %v3243_v1  ;;  %1879 = vmatprep.mubr.bf16.mxu1 %v3243_v1 }
 0x413   :  { %1809 = vmatpush1.bf16.msra.mxu0 %v3648_v57  ;;  %1850 = vmatpush1.bf16.msra.mxu1 %v3653_v58 }
 0x414   :  { %1810 = vmatprep.subr.bf16.mxu0 %v3662_v59  ;;  %1851 = vmatprep.subr.bf16.mxu1 %v3667_v60 }
 0x417   :  { %1811 = vmatpush1.bf16.msra.mxu0 %v3672_v61  ;;  %1852 = vmatpush1.bf16.msra.mxu1 %v3677_v62 }
 0x418   :  { %1812 = vmatprep.subr.bf16.mxu0 %v3686_v63  ;;  %1853 = vmatprep.subr.bf16.mxu1 %v3691_v33 }
 0x41b   :  { %1813 = vmatpush1.bf16.msra.mxu0 %v3696_v34  ;;  %1854 = vmatpush1.bf16.msra.mxu1 %v3701_v36 }
 0x41c   :  { %1814 = vmatprep.subr.bf16.mxu0 %v3708_v37  ;;  %1855 = vmatprep.subr.bf16.mxu1 %v3713_v39 }
 0x41f   :  { %1815 = vmatpush1.bf16.msra.mxu0 %v3720_v40  ;;  %1856 = vmatpush1.bf16.msra.mxu1 %v3725_v41 }
 0x420   :  { %1816 = vmatprep.subr.bf16.mxu0 %v3732_v42  ;;  %1857 = vmatprep.subr.bf16.mxu1 %v3737_v43 }
 0x423   :  { %1817 = vmatpush1.bf16.msra.mxu0 %v3744_v44  ;;  %1858 = vmatpush1.bf16.msra.mxu1 %v3749_v45 }
 0x424   :  { %1818 = vmatprep.subr.bf16.mxu0 %v3756_v2  ;;  %1859 = vmatprep.subr.bf16.mxu1 %v3761_v3 }
 0x427   :  { %1819 = vmatpush1.bf16.msra.mxu0 %v3768_v4  ;;  %1860 = vmatpush1.bf16.msra.mxu1 %v3773_v5 }
 0x428   :  { %1820 = vmatprep.subr.bf16.mxu0 %v3780_v7  ;;  %1861 = vmatprep.subr.bf16.mxu1 %v3785_v8 }
 0x42b   :  { %1821 = vmatpush1.bf16.msra.mxu0 %v3792_v9  ;;  %1862 = vmatpush1.bf16.msra.mxu1 %v3797_v10 }
 0x42c   :  { %2123 = vmatprep.subr.bf16.mxu0 %v3614_v53  ;;  %2164 = vmatprep.subr.bf16.mxu1 %v3619_v6 }
 0x4ce   :  { %v1523_v21 = vpop.f32.mrf.mxu0  ;;  %v1564_v22 = vpop.f32.mrf.mxu1 }
 0x4cf   :  { %v1571_v23 = vadd.f32 %v1523_v21, %v1291_v52  ;;  %v1573_v0 = vadd.f32 %v1564_v22, %v1293_v49 }
 0x4d0   :  { %v1525_v24 = vpop.f32.mrf.mxu0  ;;  %v1566_v25 = vpop.f32.mrf.mxu1 }
 0x4d1   :  { %v2855_v26 = vmul.f32 -1.442695, %v1571_v23  ;;  %v1572_v27 = vadd.f32 %v1525_v24, %v1292_v20  ;;  %v1574_v48 = vadd.f32 %v1566_v25, %v1294_v46 }
 0x4d2   :  { %v1527_v28 = vpop.f32.mrf.mxu0  ;;  %v1568_v29 = vpop.f32.mrf.mxu1 }
 0x4d3   :  { %3179 = vpow2.f32 %v2855_v26  ;;  %v2856_v30 = vmul.f32 -1.442695, %v1572_v27  ;;  %v2857_v50 = vmul.f32 -1.442695, %v1574_v48 }
 0x4d4   :  { %v1528_v31 = vpop.f32.mrf.mxu0  ;;  %v1569_v32 = vpop.f32.mrf.mxu1 }
 0x4d5   :  { %3181 = vpow2.f32 %v2856_v30 }
 0x4d6   :  { %3183 = vpow2.f32 %v2857_v50 }
 0x4e0   :  { %v3180_v51 = vpop.eup %3179 }
 0x4e1   :  { %v1578_v11 = vadd.f32 1.0, %v3180_v51 }
 0x4e2   :  { %v3182_v12 = vpop.eup %3181 }
 0x4e3   :  { %3185 = vrcp.f32 %v1578_v11  ;;  %v1584_v13 = vadd.f32 1.0, %v3182_v12  ;;  %v3184_v15 = vpop.eup %3183 }
 0x4e4   :  { %3187 = vtanh.f32 %v1573_v0  ;;  %v1591_v47 = vadd.f32 1.0, %v3184_v15 }
 0x4e5   :  { %3189 = vrcp.f32 %v1584_v13 }
 0x4e6   :  { %3191 = vrcp.f32 %v1591_v47 }
 0x4f0   :  { %v3186_v16 = vpop.eup %3185 }
 0x4f1   :  { %v3188_v17 = vpop.eup %3187 }
 0x4f2   :  { %v3190_v19 = vpop.eup %3189  ;;  %v1596_v52 = vmul.f32 %v3188_v17, %v3186_v16 }
 0x4f3   :  { %v1595_v20 = vmul.f32 %v3190_v19, %v3812_v14  ;;  %v3192_v22 = vpop.eup %3191  ;;  %v2858_v14 = vld [vmem:[%s3996_s0 + $0x50] sm:$0xff] }
 0x4f4   :  { %v1609_v27 = vunpack.c.h.bf16 %v2858_v14 }
 0x4f5   :  { %v3859_v21 = vadd.f32 %v1596_v52, %v1595_v20 }
 0x4f7   :  { %3193 = vtanh.f32 %v3859_v21 }
 0x504   :  { %v3194_v23 = vpop.eup %3193 }
 0x505   :  { %v1599_v24 = vmul.f32 %v3194_v23, %v3192_v22 }
 0x507   :  { %v3863_v25 = vadd.f32 %v1599_v24, %v3816_v18  ;;  %v1613_v26 = vpack.c.bf16 %v1599_v24, %v1599_v24  ;;  %v1608_v18 = vunpack.c.l.bf16 %v2858_v14 }
 0x509   :  { %1839 = vmatmul.mubr.bf16.vlgmr.msra.gmra.mxu0 %v1613_v26  ;;  %1880 = vmatmul.mubr.bf16.vlgmr.msra.gmra.mxu1 %v1613_v26 }
 0x50a   :  { %2124 = vmatpush1.bf16.msra.mxu0 %v3624_v38  ;;  %2165 = vmatpush1.bf16.msra.mxu1 %v3629_v54 }
 0x50b   :  { %2125 = vmatprep.subr.bf16.mxu0 %v3638_v55  ;;  %2166 = vmatprep.subr.bf16.mxu1 %v3643_v56 }
 0x50c   :  { %2155 = vmatprep.mubr.bf16.mxu0 %v3243_v1  ;;  %2196 = vmatprep.mubr.bf16.mxu1 %v3243_v1 }
 0x50e   :  { %2126 = vmatpush1.bf16.msra.mxu0 %v3648_v57  ;;  %2167 = vmatpush1.bf16.msra.mxu1 %v3653_v58 }
 0x50f   :  { %2127 = vmatprep.subr.bf16.mxu0 %v3662_v59  ;;  %2168 = vmatprep.subr.bf16.mxu1 %v3667_v60 }
 0x512   :  { %2128 = vmatpush1.bf16.msra.mxu0 %v3672_v61  ;;  %2169 = vmatpush1.bf16.msra.mxu1 %v3677_v62 }
 0x513   :  { %2129 = vmatprep.subr.bf16.mxu0 %v3686_v63  ;;  %2170 = vmatprep.subr.bf16.mxu1 %v3691_v33 }
 0x516   :  { %2130 = vmatpush1.bf16.msra.mxu0 %v3696_v34  ;;  %2171 = vmatpush1.bf16.msra.mxu1 %v3701_v36 }
 0x517   :  { %2131 = vmatprep.subr.bf16.mxu0 %v3708_v37  ;;  %2172 = vmatprep.subr.bf16.mxu1 %v3713_v39 }
 0x51a   :  { %2132 = vmatpush1.bf16.msra.mxu0 %v3720_v40  ;;  %2173 = vmatpush1.bf16.msra.mxu1 %v3725_v41 }
 0x51b   :  { %2133 = vmatprep.subr.bf16.mxu0 %v3732_v42  ;;  %2174 = vmatprep.subr.bf16.mxu1 %v3737_v43 }
 0x51e   :  { %2134 = vmatpush1.bf16.msra.mxu0 %v3744_v44  ;;  %2175 = vmatpush1.bf16.msra.mxu1 %v3749_v45 }
 0x51f   :  { %2135 = vmatprep.subr.bf16.mxu0 %v3756_v2  ;;  %2176 = vmatprep.subr.bf16.mxu1 %v3761_v3 }
 0x522   :  { %2136 = vmatpush1.bf16.msra.mxu0 %v3768_v4  ;;  %2177 = vmatpush1.bf16.msra.mxu1 %v3773_v5 }
 0x523   :  { %2137 = vmatprep.subr.bf16.mxu0 %v3780_v7  ;;  %2178 = vmatprep.subr.bf16.mxu1 %v3785_v8 }
 0x526   :  { %2138 = vmatpush1.bf16.msra.mxu0 %v3792_v9  ;;  %2179 = vmatpush1.bf16.msra.mxu1 %v3797_v10 }
 0x527   :  { %2440 = vmatprep.subr.bf16.mxu0 %v3614_v53  ;;  %2481 = vmatprep.subr.bf16.mxu1 %v3619_v6  ;;  %v2859_v6 = vld [vmem:[%s3996_s0 + $0x58] sm:$0xff] }
 0x528   :  { %v1611_v0 = vunpack.c.h.bf16 %v2859_v6  ;;  %v1610_v12 = vunpack.c.l.bf16 %v2859_v6  ;;  %v3109_v6 = vld [vmem:[%s3997_s2 + $0x28] sm:$0xff]  }
 0x5c9   :  { %v1840_v28 = vpop.f32.mrf.mxu0  ;;  %v1881_v29 = vpop.f32.mrf.mxu1 }
 0x5ca   :  { %v1888_v30 = vadd.f32 %v1840_v28, %v1608_v18  ;;  %v1890_v16 = vadd.f32 %v1881_v29, %v1610_v12  ;;  %v3112_v12 = vld [vmem:[%s3997_s2 + $0x10] sm:$0xff]  }
 0x5cb   :  { %v1842_v31 = vpop.f32.mrf.mxu0  ;;  %v1883_v32 = vpop.f32.mrf.mxu1 }
 0x5cc   :  { %v2892_v35 = vmul.f32 -1.442695, %v1888_v30  ;;  %v1889_v46 = vadd.f32 %v1842_v31, %v1609_v27  ;;  %v1891_v11 = vadd.f32 %v1883_v32, %v1611_v0  ;;  %v3110_v0 = vld [vmem:[%s3997_s2 + $0x20] sm:$0xff]  }
 0x5cd   :  { %v1844_v48 = vpop.f32.mrf.mxu0  ;;  %v1885_v49 = vpop.f32.mrf.mxu1 }
 0x5ce   :  { %3195 = vpow2.f32 %v2892_v35  ;;  %v2893_v50 = vmul.f32 -1.442695, %v1889_v46  ;;  %v2894_v13 = vmul.f32 -1.442695, %v1891_v11  ;;  %v3111_v11 = vld [vmem:[%s3997_s2 + $0x18] sm:$0xff]  }
 0x5cf   :  { %v1845_v53 = vpop.f32.mrf.mxu0  ;;  %v1886_v51 = vpop.f32.mrf.mxu1 }
 0x5d0   :  { %3197 = vpow2.f32 %v2893_v50  ;;  %v3107_v50 = vld [vmem:[%s3997_s2 + $0x38] sm:$0xff]   ;;  %v3245_v53 = vmov 0.0   ;;  %v3108_v51 = vld [vmem:[%s3997_s2 + $0x30] sm:$0xff]  }
 0x5d1   :  { %3199 = vpow2.f32 %v2894_v13  ;;  %v3113_v13 = vld [vmem:[%s3997_s2 + $0x8] sm:$0xff]  }
 0x5db   :  { %v3196_v15 = vpop.eup %3195 }
 0x5dc   :  { %v1895_v17 = vadd.f32 1.0, %v3196_v15  ;;  %v3114_v15 = vld [vmem:[%s3997_s2] sm:$0xff]  }
 0x5dd   :  { %v3198_v19 = vpop.eup %3197 }
 0x5de   :  { %3201 = vrcp.f32 %v1895_v17  ;;  %v1901_v47 = vadd.f32 1.0, %v3198_v19  ;;  %v3200_v52 = vpop.eup %3199 }
 0x5df   :  { %3203 = vtanh.f32 %v1890_v16  ;;  %v1908_v24 = vadd.f32 1.0, %v3200_v52  ;;  %v2932_v16 = vld [vmem:[%s3996_s0 + $0x70] sm:$0xff] }
 0x5e0   :  { %3205 = vrcp.f32 %v1901_v47  ;;  %v2242_v17 = vunpack.c.l.bf16 %v2932_v16  ;;  %v2243_v19 = vunpack.c.h.bf16 %v2932_v16 }
 0x5e1   :  { %3207 = vrcp.f32 %v1908_v24 }
 0x5eb   :  { %v3202_v20 = vpop.eup %3201 }
 0x5ec   :  { %v3204_v22 = vpop.eup %3203 }
 0x5ed   :  { %v3206_v23 = vpop.eup %3205  ;;  %v1913_v26 = vmul.f32 %v3204_v22, %v3202_v20 }
 0x5ee   :  { %v1912_v14 = vmul.f32 %v3206_v23, %v3859_v21  ;;  %v3208_v27 = vpop.eup %3207 }
 0x5f0   :  { %v3906_v18 = vadd.f32 %v1913_v26, %v1912_v14 }
 0x5f2   :  { %3209 = vtanh.f32 %v3906_v18 }
 0x5ff   :  { %v3210_v28 = vpop.eup %3209 }
 0x600   :  { %v1916_v29 = vmul.f32 %v3210_v28, %v3208_v27 }
 0x602   :  { %v3910_v30 = vadd.f32 %v1916_v29, %v3863_v25  ;;  %v1930_v31 = vpack.c.bf16 %v1916_v29, %v1916_v29 }
 0x604   :  { %2156 = vmatmul.mubr.bf16.vlgmr.msra.gmra.mxu0 %v1930_v31  ;;  %2197 = vmatmul.mubr.bf16.vlgmr.msra.gmra.mxu1 %v1930_v31 }
 0x605   :  { %2441 = vmatpush1.bf16.msra.mxu0 %v3624_v38  ;;  %2482 = vmatpush1.bf16.msra.mxu1 %v3629_v54 }
 0x606   :  { %2442 = vmatprep.subr.bf16.mxu0 %v3638_v55  ;;  %2483 = vmatprep.subr.bf16.mxu1 %v3643_v56 }
 0x607   :  { %2472 = vmatprep.mubr.bf16.mxu0 %v3243_v1  ;;  %2513 = vmatprep.mubr.bf16.mxu1 %v3243_v1  ;;  %v2895_v1 = vld [vmem:[%s3996_s0 + $0x60] sm:$0xff] }
 0x608   :  { %v1925_v38 = vunpack.c.l.bf16 %v2895_v1  ;;  %v1926_v54 = vunpack.c.h.bf16 %v2895_v1 }
 0x609   :  { %2443 = vmatpush1.bf16.msra.mxu0 %v3648_v57  ;;  %2484 = vmatpush1.bf16.msra.mxu1 %v3653_v58 }
 0x60a   :  { %2444 = vmatprep.subr.bf16.mxu0 %v3662_v59  ;;  %2485 = vmatprep.subr.bf16.mxu1 %v3667_v60 }
 0x60d   :  { %2445 = vmatpush1.bf16.msra.mxu0 %v3672_v61  ;;  %2486 = vmatpush1.bf16.msra.mxu1 %v3677_v62 }
 0x60e   :  { %2446 = vmatprep.subr.bf16.mxu0 %v3686_v63  ;;  %2487 = vmatprep.subr.bf16.mxu1 %v3691_v33 }
 0x611   :  { %2447 = vmatpush1.bf16.msra.mxu0 %v3696_v34  ;;  %2488 = vmatpush1.bf16.msra.mxu1 %v3701_v36 }
 0x612   :  { %2448 = vmatprep.subr.bf16.mxu0 %v3708_v37  ;;  %2489 = vmatprep.subr.bf16.mxu1 %v3713_v39  ;;  %v2896_v37 = vld [vmem:[%s3996_s0 + $0x68] sm:$0xff] }
 0x613   :  { %v1928_v39 = vunpack.c.h.bf16 %v2896_v37 }
 0x615   :  { %2449 = vmatpush1.bf16.msra.mxu0 %v3720_v40  ;;  %2490 = vmatpush1.bf16.msra.mxu1 %v3725_v41  ;;  %v1927_v41 = vunpack.c.l.bf16 %v2896_v37 }
 0x616   :  { %2450 = vmatprep.subr.bf16.mxu0 %v3732_v42  ;;  %2491 = vmatprep.subr.bf16.mxu1 %v3737_v43 }
 0x619   :  { %2451 = vmatpush1.bf16.msra.mxu0 %v3744_v44  ;;  %2492 = vmatpush1.bf16.msra.mxu1 %v3749_v45 }
 0x61a   :  { %2452 = vmatprep.subr.bf16.mxu0 %v3756_v2  ;;  %2493 = vmatprep.subr.bf16.mxu1 %v3761_v3 }
 0x61d   :  { %2453 = vmatpush1.bf16.msra.mxu0 %v3768_v4  ;;  %2494 = vmatpush1.bf16.msra.mxu1 %v3773_v5 }
 0x61e   :  { %2454 = vmatprep.subr.bf16.mxu0 %v3780_v7  ;;  %2495 = vmatprep.subr.bf16.mxu1 %v3785_v8 }
 0x621   :  { %2455 = vmatpush1.bf16.msra.mxu0 %v3792_v9  ;;  %2496 = vmatpush1.bf16.msra.mxu1 %v3797_v10 }
 0x622   :  { %2987 = vmatprep.subr.bf16.mxu0 %v3245_v53 }
 0x6c4   :  { %v2157_v55 = vpop.f32.mrf.mxu0  ;;  %v2198_v56 = vpop.f32.mrf.mxu1 }
 0x6c5   :  { %v2205_v57 = vadd.f32 %v2157_v55, %v1925_v38  ;;  %v2207_v44 = vadd.f32 %v2198_v56, %v1927_v41 }
 0x6c6   :  { %v2159_v58 = vpop.f32.mrf.mxu0  ;;  %v2200_v59 = vpop.f32.mrf.mxu1 }
 0x6c7   :  { %v2929_v60 = vmul.f32 -1.442695, %v2205_v57  ;;  %v2206_v61 = vadd.f32 %v2159_v58, %v1926_v54  ;;  %v2208_v40 = vadd.f32 %v2200_v59, %v1928_v39 }
 0x6c8   :  { %v2161_v62 = vpop.f32.mrf.mxu0  ;;  %v2202_v63 = vpop.f32.mrf.mxu1 }
 0x6c9   :  { %3211 = vpow2.f32 %v2929_v60  ;;  %v2930_v33 = vmul.f32 -1.442695, %v2206_v61  ;;  %v2931_v42 = vmul.f32 -1.442695, %v2208_v40 }
 0x6ca   :  { %v2162_v34 = vpop.f32.mrf.mxu0  ;;  %v2203_v36 = vpop.f32.mrf.mxu1 }
 0x6cb   :  { %3213 = vpow2.f32 %v2930_v33 }
 0x6cc   :  { %3215 = vpow2.f32 %v2931_v42 }
 0x6d6   :  { %v3212_v43 = vpop.eup %3211 }
 0x6d7   :  { %v2212_v45 = vadd.f32 1.0, %v3212_v43 }
 0x6d8   :  { %v3214_v2 = vpop.eup %3213 }
 0x6d9   :  { %3217 = vrcp.f32 %v2212_v45  ;;  %v2218_v3 = vadd.f32 1.0, %v3214_v2  ;;  %v3216_v4 = vpop.eup %3215  ;;  %v2969_v45 = vld [vmem:[%s3998_s3] ss:$0 sm:$0xff] }
 0x6da   :  { %3219 = vtanh.f32 %v2207_v44  ;;  %v2225_v9 = vadd.f32 1.0, %v3216_v4 }
 0x6db   :  { %3221 = vrcp.f32 %v2218_v3 }
 0x6dc   :  { %3223 = vrcp.f32 %v2225_v9 }
 0x6e6   :  { %v3218_v5 = vpop.eup %3217 }
 0x6e7   :  { %v3220_v7 = vpop.eup %3219 }
 0x6e8   :  { %v3222_v8 = vpop.eup %3221  ;;  %v2230_v10 = vmul.f32 %v3220_v7, %v3218_v5 }
 0x6e9   :  { %v2229_v21 = vmul.f32 %v3222_v8, %v3906_v18  ;;  %v3224_v32 = vpop.eup %3223 }
 0x6eb   :  { %v3951_v25 = vadd.f32 %v2230_v10, %v2229_v21 }
 0x6ed   :  { %3225 = vtanh.f32 %v3951_v25 }
 0x6fa   :  { %v3226_v35 = vpop.eup %3225 }
 0x6fb   :  { %v2233_v46 = vmul.f32 %v3226_v35, %v3224_v32 }
 0x6fd   :  { %v2247_v48 = vpack.c.bf16 %v2233_v46, %v2233_v46  ;;  %v3955_v49 = vadd.f32 %v2233_v46, %v3910_v30  ;;  %v2933_v30 = vld [vmem:[%s3996_s0 + $0x78] sm:$0xff] }
 0x6fe   :  { %v2245_v31 = vunpack.c.h.bf16 %v2933_v30  ;;  %v2244_v38 = vunpack.c.l.bf16 %v2933_v30 }
 0x6ff   :  { %2473 = vmatmul.mubr.bf16.vlgmr.msra.gmra.mxu0 %v2247_v48  ;;  %2514 = vmatmul.mubr.bf16.vlgmr.msra.gmra.mxu1 %v2247_v48 }
 0x700   :  { %2988 = vmatpush3.bf16.msra.mxu0 %v3107_v50  ;;  %3003 = vmatprep.mubr.msk.bf16.mxu0 %vm3246_vm0, %v3245_v53 }
 0x701   :  { %2989 = vmatprep.subr.bf16.mxu0 %v3245_v53 }
 0x704   :  { %2990 = vmatpush3.bf16.msra.mxu0 %v3108_v51 }
 0x705   :  { %2991 = vmatprep.subr.bf16.mxu0 %v3245_v53 }
 0x708   :  { %2992 = vmatpush3.bf16.msra.mxu0 %v3109_v6 }
 0x709   :  { %2993 = vmatprep.subr.bf16.mxu0 %v3245_v53 }
 0x70c   :  { %2994 = vmatpush3.bf16.msra.mxu0 %v3110_v0 }
 0x70d   :  { %2995 = vmatprep.subr.bf16.mxu0 %v3245_v53 }
 0x710   :  { %2996 = vmatpush3.bf16.msra.mxu0 %v3111_v11 }
 0x711   :  { %2997 = vmatprep.subr.bf16.mxu0 %v3245_v53 }
 0x714   :  { %2998 = vmatpush3.bf16.msra.mxu0 %v3112_v12 }
 0x715   :  { %2999 = vmatprep.subr.bf16.mxu0 %v3245_v53 }
 0x718   :  { %3000 = vmatpush3.bf16.msra.mxu0 %v3113_v13 }
 0x719   :  { %3001 = vmatprep.subr.bf16.mxu0 %v3245_v53 }
 0x71c   :  { %3002 = vmatpush3.bf16.msra.mxu0 %v3114_v15 }
 0x7bf   :  { %v2474_v47 = vpop.f32.mrf.mxu0  ;;  %v2515_v52 = vpop.f32.mrf.mxu1 }
 0x7c0   :  { %v2522_v20 = vadd.f32 %v2474_v47, %v2242_v17  ;;  %v2524_v56 = vadd.f32 %v2515_v52, %v2244_v38 }
 0x7c1   :  { %v2476_v22 = vpop.f32.mrf.mxu0  ;;  %v2517_v23 = vpop.f32.mrf.mxu1 }
 0x7c2   :  { %v2966_v24 = vmul.f32 -1.442695, %v2522_v20  ;;  %v2523_v26 = vadd.f32 %v2476_v22, %v2243_v19  ;;  %v2525_v1 = vadd.f32 %v2517_v23, %v2245_v31 }
 0x7c3   :  { %v2478_v14 = vpop.f32.mrf.mxu0  ;;  %v2519_v18 = vpop.f32.mrf.mxu1 }
 0x7c4   :  { %3227 = vpow2.f32 %v2966_v24  ;;  %v2967_v27 = vmul.f32 -1.442695, %v2523_v26  ;;  %v2968_v54 = vmul.f32 -1.442695, %v2525_v1 }
 0x7c5   :  { %v2479_v28 = vpop.f32.mrf.mxu0  ;;  %v2520_v29 = vpop.f32.mrf.mxu1 }
 0x7c6   :  { %3229 = vpow2.f32 %v2967_v27 }
 0x7c7   :  { %3231 = vpow2.f32 %v2968_v54 }
 0x7d1   :  { %v3228_v55 = vpop.eup %3227 }
 0x7d2   :  { %v2529_v57 = vadd.f32 1.0, %v3228_v55 }
 0x7d3   :  { %v3230_v58 = vpop.eup %3229 }
 0x7d4   :  { %3233 = vrcp.f32 %v2529_v57  ;;  %v2535_v59 = vadd.f32 1.0, %v3230_v58  ;;  %v3232_v60 = vpop.eup %3231 }
 0x7d5   :  { %3235 = vtanh.f32 %v2524_v56  ;;  %v2542_v33 = vadd.f32 1.0, %v3232_v60 }
 0x7d6   :  { %3237 = vrcp.f32 %v2535_v59 }
 0x7d7   :  { %3239 = vrcp.f32 %v2542_v33 }
 0x7e1   :  { %v3234_v61 = vpop.eup %3233 }
 0x7e2   :  { %v3236_v62 = vpop.eup %3235 }
 0x7e3   :  { %v3238_v63 = vpop.eup %3237  ;;  %v2547_v34 = vmul.f32 %v3236_v62, %v3234_v61 }
 0x7e4   :  { %v2546_v36 = vmul.f32 %v3238_v63, %v3951_v25  ;;  %v3240_v39 = vpop.eup %3239 }
 0x7e6   :  { %v2548_v37 = vadd.f32 %v2547_v34, %v2546_v36 }
 0x7e8   :  { %3241 = vtanh.f32 %v2548_v37 }
 0x7f5   :  { %v3242_v40 = vpop.eup %3241 }
 0x7f6   :  { %v2550_v41 = vmul.f32 %v3242_v40, %v3240_v39 }
 0x7f8   :  { %v2554_v42 = vadd.f32 %v2550_v41, %v3955_v49 }
 0x7fa   :  { %v2557_v43 = vmul.f32 0.125, %v2554_v42 }
 0x7fc   :  { %v2558_v44 = vpack.c.bf16 %v2557_v43, %v2557_v43 }
 0x7fe   :  { %3004 = vmatmul.mubr.bf16.vlgmr.msra.gmra.mxu0 %v2558_v44 }
 0x8be   :  { %v2664_v2 = vpop.f32.mrf.mxu0 }
 0x8bf   :  { %v2665_v3 = vadd.f32 %v2969_v45, %v2664_v2 }
 0x8c0   :  { %v3005_v4 = vpop.f32.mrf.mxu0 }
 0x8c1   :  { %2670 = vst [vmem:[%s3999_s4] sm:$0xff] %v2665_v3 }
 0x8c2   :  { %v2667_v5 = vpop.f32.mrf.mxu0 }
 0x8c4   :  { %v3006_v7 = vpop.f32.mrf.mxu0 }

</bundles_post_ra>
